<compile_context>
chip_gen: v6e
topology: v6e:2x2x1
jax: 0.10.0
libtpu: 0.0.40
codegen_flags: <defaults>
</compile_context>

<pallas_src>
import jax
import jax.numpy as jnp
from jax.experimental import pallas as pl
from jax.experimental.pallas import tpu as pltpu


def _round_up(x, m):
    return (x + m - 1) // m * m


def _semi_classifier_kernel(x_ref, w1_ref, b1_ref, mask_ref, w2_ref, b2_ref,
                            o_ref, acc_ref):
    """Grid = (batch_tiles, k_tiles).  acc_ref accumulates x @ W1 over k."""
    k = pl.program_id(1)

    @pl.when(k == 0)
    def _init():
        acc_ref[...] = jnp.zeros_like(acc_ref)

    # ---- bottleneck matmul partial: (TB, TK) @ (TK, 256) on the MXU ---------
    acc_ref[...] += jnp.dot(x_ref[...], w1_ref[...],
                            preferred_element_type=jnp.float32)

    @pl.when(k == pl.num_programs(1) - 1)
    def _finalize():
        h = acc_ref[...] + b1_ref[...]          # bias       (f32, VPU)
        h = jnp.maximum(h, 0.0)                 # ReLU       (VPU)
        h = h * mask_ref[...]                   # Dropout (pre-scaled keep mask)
        # ---- head: (TB, 256) @ (256, Cp) on the MXU -------------------------
        out = jnp.dot(h.astype(w2_ref.dtype), w2_ref[...],
                      preferred_element_type=jnp.float32) + b2_ref[...]
        o_ref[...] = out.astype(o_ref.dtype)


def semi_classifier_forward(x_feat, w1, b1, w2, b2, *, seed=0,
                            training=True, drop_p=0.5,
                            block_b=128, block_k=512):
    """x_feat: (B, out_feature) f32 (already backbone'd + flattened).

    w1: (out_feature, 256), b1: (1, 256), w2: (256, num_classes), b2: (1, num_classes)
    (weights stored pre-transposed as (in, out) so y = x @ W + b).
    """
    B, F = x_feat.shape
    H = w1.shape[1]            # 256
    C = w2.shape[1]            # num_classes

    # ---- padding to MXU / lane-friendly shapes ------------------------------
    Bp = _round_up(B, block_b)            # full MXU M tiles, lane-dense stores
    Fp = _round_up(F, block_k)            # clean K tiling
    Cp = _round_up(C, 128)                # lane-dense output (no masked vst)

    # bf16 matmul operands (f32 accumulation happens inside the kernel).
    xp = jnp.zeros((Bp, Fp), jnp.bfloat16).at[:B, :F].set(
        x_feat.astype(jnp.bfloat16))
    w1p = jnp.zeros((Fp, H), jnp.bfloat16).at[:F, :].set(w1.astype(jnp.bfloat16))
    w2p = jnp.zeros((H, Cp), jnp.bfloat16).at[:, :C].set(w2.astype(jnp.bfloat16))
    b1p = b1.reshape(1, H).astype(jnp.float32)
    b2p = jnp.zeros((1, Cp), jnp.float32).at[:, :C].set(
        b2.reshape(1, C).astype(jnp.float32))

    # Dropout keep-mask, pre-scaled by 1/(1-p).  Eval mode -> identity (ones).
    if training:
        keep = jax.random.bernoulli(jax.random.PRNGKey(seed),
                                    1.0 - drop_p, (Bp, H))
        mask = keep.astype(jnp.float32) * (1.0 / (1.0 - drop_p))
    else:
        mask = jnp.ones((Bp, H), jnp.float32)

    nb = Bp // block_b
    nk = Fp // block_k

    cost = pl.CostEstimate(
        flops=2 * Bp * Fp * H + 2 * Bp * H * Cp,
        transcendentals=0,
        bytes_accessed=(xp.size * 2 + w1p.size * 2 + w2p.size * 2
                        + b1p.size * 4 + b2p.size * 4 + mask.size * 4
                        + Bp * Cp * 4))

    grid_spec = pltpu.PrefetchScalarGridSpec(
        num_scalar_prefetch=0,
        grid=(nb, nk),
        in_specs=[
            pl.BlockSpec((block_b, block_k), lambda i, k: (i, k)),   # x tile
            pl.BlockSpec((block_k, H),       lambda i, k: (k, 0)),   # W1 tile
            pl.BlockSpec((1, H),             lambda i, k: (0, 0)),   # b1 (resident)
            pl.BlockSpec((block_b, H),       lambda i, k: (i, 0)),   # dropout mask
            pl.BlockSpec((H, Cp),            lambda i, k: (0, 0)),   # W2 (resident)
            pl.BlockSpec((1, Cp),            lambda i, k: (0, 0)),   # b2 (resident)
        ],
        out_specs=pl.BlockSpec((block_b, Cp), lambda i, k: (i, 0)),
        scratch_shapes=[pltpu.VMEM((block_b, H), jnp.float32)],      # accumulator
    )

    out_padded = pl.pallas_call(
        _semi_classifier_kernel,
        out_shape=jax.ShapeDtypeStruct((Bp, Cp), jnp.float32),
        grid_spec=grid_spec,
        compiler_params=pltpu.CompilerParams(
            dimension_semantics=("parallel", "arbitrary"),
            vmem_limit_bytes=64 * 1024 * 1024),
        cost_estimate=cost,
    )(xp, w1p, b1p, mask, w2p, b2p)

    return out_padded[:B, :C]


def _init_linear(key, fan_in, fan_out):
    """PyTorch nn.Linear default init (uniform +/- 1/sqrt(fan_in)); weight
    stored transposed as (in, out)."""
    kw, kb = jax.random.split(key)
    bound = 1.0 / (fan_in ** 0.5)
    w = jax.random.uniform(kw, (fan_in, fan_out), jnp.float32, -bound, bound)
    b = jax.random.uniform(kb, (1, fan_out), jnp.float32, -bound, bound)
    return w, b


if __name__ == "__main__":
    # Small shapes consistent with the module.
    B, Cc, Hh, Ww = 2, 4, 16, 16          # NCHW conv-style input
    out_feature = Cc * Hh * Ww            # 1024 (identity backbone)
    hidden = 256
    num_classes = 10

    root = jax.random.PRNGKey(0)
    kx, k1, k2 = jax.random.split(root, 3)

    x = jax.random.normal(kx, (B, Cc, Hh, Ww), jnp.float32)   # NCHW
    w1, b1 = _init_linear(k1, out_feature, hidden)
    w2, b2 = _init_linear(k2, hidden, num_classes)

    # Glue: backbone (identity) + flatten(start_dim=1), done in plain JAX.
    x_feat = x.reshape(B, -1)

    # Training-mode forward (dropout active, deterministic seed).
    y_train = semi_classifier_forward(x_feat, w1, b1, w2, b2,
                                      seed=0, training=True)
    jax.block_until_ready(y_train)

    # Eval-mode forward (dropout = identity) checked against a JAX reference
    # computed with the same bf16-cast matmul operands.
    y_eval = semi_classifier_forward(x_feat, w1, b1, w2, b2,
                                     seed=0, training=False)
    jax.block_until_ready(y_eval)

    xb = x_feat.astype(jnp.bfloat16).astype(jnp.float32)
    w1b = w1.astype(jnp.bfloat16).astype(jnp.float32)
    w2b = w2.astype(jnp.bfloat16).astype(jnp.float32)
    h_ref = jnp.maximum(xb @ w1b + b1, 0.0)
    h_ref = h_ref.astype(jnp.bfloat16).astype(jnp.float32)
    y_ref = h_ref @ w2b + b2

    assert y_train.shape == (B, num_classes)
    assert y_eval.shape == (B, num_classes)
    assert jnp.allclose(y_eval, y_ref, atol=1e-2, rtol=1e-2)

    print("KERNEL_OK")
</pallas_src>

<mosaic_0001>
module attributes {stable_mosaic.version = 11 : i64} {
  func.func @_semi_classifier_kernel(%arg0: i32, %arg1: i32, %arg2: memref<128x512xbf16, #tpu.memory_space<vmem>>, %arg3: memref<512x256xbf16, #tpu.memory_space<vmem>>, %arg4: memref<1x256xf32, #tpu.memory_space<vmem>>, %arg5: memref<128x256xf32, #tpu.memory_space<vmem>>, %arg6: memref<256x128xbf16, #tpu.memory_space<vmem>>, %arg7: memref<1x128xf32, #tpu.memory_space<vmem>>, %arg8: memref<128x128xf32, #tpu.memory_space<vmem>>, %arg9: memref<128x256xf32, #tpu.memory_space<vmem>>) attributes {dimension_semantics = [#tpu.dimension_semantics<parallel>, #tpu.dimension_semantics<arbitrary>], iteration_bounds = array<i64: 1, 2>, scalar_prefetch = 0 : i64, scratch_operands = 1 : i64, tpu.core_type = #tpu.core_type<tc>, window_params = [{transform_indices = @transform_0, window_bounds = array<i64: 128, 512>}, {transform_indices = @transform_1, window_bounds = array<i64: 512, 256>}, {pipeline_mode = #tpu.pipeline_mode<synchronous>, transform_indices = @transform_2, window_bounds = array<i64: 1, 256>}, {transform_indices = @transform_3, window_bounds = array<i64: 128, 256>}, {pipeline_mode = #tpu.pipeline_mode<synchronous>, transform_indices = @transform_4, window_bounds = array<i64: 256, 128>}, {pipeline_mode = #tpu.pipeline_mode<synchronous>, transform_indices = @transform_5, window_bounds = array<i64: 1, 128>}, {transform_indices = @transform_6, window_bounds = array<i64: 128, 128>}]} {
    %c0_i32 = arith.constant 0 : i32
    %0 = arith.cmpi eq, %arg1, %c0_i32 : i32
    %1 = arith.extui %0 : i1 to i32
    %c0_i32_0 = arith.constant 0 : i32
    %2 = arith.cmpi ne, %1, %c0_i32_0 : i32
    scf.if %2 {
      %cst_9 = arith.constant 0.000000e+00 : f32
      %12 = vector.broadcast %cst_9 : f32 to vector<128x256xf32>
      %c0_10 = arith.constant 0 : index
      %c0_11 = arith.constant 0 : index
      %13 = vector.load %arg9[%c0_10, %c0_11] : memref<128x256xf32, #tpu.memory_space<vmem>>, vector<128x256xf32>
      tpu.vector_store %arg9[%c0_10, %c0_11], %12 {strides = array<i32>} : memref<128x256xf32, #tpu.memory_space<vmem>>, vector<128x256xf32>,
    } else {
    }
    %c0 = arith.constant 0 : index
    %c0_1 = arith.constant 0 : index
    %3 = vector.load %arg9[%c0, %c0_1] : memref<128x256xf32, #tpu.memory_space<vmem>>, vector<128x256xf32>
    %c0_2 = arith.constant 0 : index
    %c0_3 = arith.constant 0 : index
    %4 = vector.load %arg2[%c0_2, %c0_3] : memref<128x512xbf16, #tpu.memory_space<vmem>>, vector<128x512xbf16>
    %c0_4 = arith.constant 0 : index
    %c0_5 = arith.constant 0 : index
    %5 = vector.load %arg3[%c0_4, %c0_5] : memref<512x256xbf16, #tpu.memory_space<vmem>>, vector<512x256xbf16>
    %cst = arith.constant dense<0.000000e+00> : vector<128x256xf32>
    %6 = tpu.matmul %4, %5, %cst {dimension_numbers = #tpu.dot_dimension_numbers<[1], [0], [0], [1], [0, 0, 1, 1], [], []>} : vector<128x512xbf16>, vector<512x256xbf16>, vector<128x256xf32> -> vector<128x256xf32>
    %7 = arith.addf %3, %6 : vector<128x256xf32>
    %c0_6 = arith.constant 0 : index
    %c0_7 = arith.constant 0 : index
    %8 = vector.load %arg9[%c0_6, %c0_7] : memref<128x256xf32, #tpu.memory_space<vmem>>, vector<128x256xf32>
    tpu.vector_store %arg9[%c0_6, %c0_7], %7 {strides = array<i32>} : memref<128x256xf32, #tpu.memory_space<vmem>>, vector<128x256xf32>,
    %c1_i32 = arith.constant 1 : i32
    %9 = arith.cmpi eq, %arg1, %c1_i32 : i32
    %10 = arith.extui %9 : i1 to i32
    %c0_i32_8 = arith.constant 0 : i32
    %11 = arith.cmpi ne, %10, %c0_i32_8 : i32
    scf.if %11 {
      %c0_9 = arith.constant 0 : index
      %c0_10 = arith.constant 0 : index
      %12 = vector.load %arg9[%c0_9, %c0_10] : memref<128x256xf32, #tpu.memory_space<vmem>>, vector<128x256xf32>
      %c0_11 = arith.constant 0 : index
      %c0_12 = arith.constant 0 : index
      %13 = vector.load %arg4[%c0_11, %c0_12] : memref<1x256xf32, #tpu.memory_space<vmem>>, vector<1x256xf32>
      %14 = vector.broadcast %13 : vector<1x256xf32> to vector<128x256xf32>
      %15 = arith.addf %12, %14 : vector<128x256xf32>
      %cst_13 = arith.constant 0.000000e+00 : f32
      %16 = vector.broadcast %cst_13 : f32 to vector<128x256xf32>
      %17 = arith.maximumf %15, %16 : vector<128x256xf32>
      %c0_14 = arith.constant 0 : index
      %c0_15 = arith.constant 0 : index
      %18 = vector.load %arg5[%c0_14, %c0_15] : memref<128x256xf32, #tpu.memory_space<vmem>>, vector<128x256xf32>
      %19 = arith.mulf %17, %18 : vector<128x256xf32>
      %20 = arith.truncf %19 : vector<128x256xf32> to vector<128x256xbf16>
      %c0_16 = arith.constant 0 : index
      %c0_17 = arith.constant 0 : index
      %21 = vector.load %arg6[%c0_16, %c0_17] : memref<256x128xbf16, #tpu.memory_space<vmem>>, vector<256x128xbf16>
      %cst_18 = arith.constant dense<0.000000e+00> : vector<128x128xf32>
      %22 = tpu.matmul %20, %21, %cst_18 {dimension_numbers = #tpu.dot_dimension_numbers<[1], [0], [0], [1], [0, 0, 1, 1], [], []>} : vector<128x256xbf16>, vector<256x128xbf16>, vector<128x128xf32> -> vector<128x128xf32>
      %c0_19 = arith.constant 0 : index
      %c0_20 = arith.constant 0 : index
      %23 = vector.load %arg7[%c0_19, %c0_20] : memref<1x128xf32, #tpu.memory_space<vmem>>, vector<1x128xf32>
      %24 = vector.broadcast %23 : vector<1x128xf32> to vector<128x128xf32>
      %25 = arith.addf %22, %24 : vector<128x128xf32>
      %c0_21 = arith.constant 0 : index
      %c0_22 = arith.constant 0 : index
      %26 = vector.load %arg8[%c0_21, %c0_22] : memref<128x128xf32, #tpu.memory_space<vmem>>, vector<128x128xf32>
      tpu.vector_store %arg8[%c0_21, %c0_22], %25 {strides = array<i32>} : memref<128x128xf32, #tpu.memory_space<vmem>>, vector<128x128xf32>,
    } else {
    }
    return
  }
  func.func @transform_0(%arg0: i32, %arg1: i32) -> (i32, i32) {
    %c0_i32 = arith.constant 0 : i32
    return %arg0, %arg1 : i32, i32
  }
  func.func @transform_1(%arg0: i32, %arg1: i32) -> (i32, i32) {
    %c0_i32 = arith.constant 0 : i32
    %c0_i32_0 = arith.constant 0 : i32
    return %arg1, %c0_i32 : i32, i32
  }
  func.func @transform_2(%arg0: i32, %arg1: i32) -> (i32, i32) {
    %c0_i32 = arith.constant 0 : i32
    %c0_i32_0 = arith.constant 0 : i32
    %c0_i32_1 = arith.constant 0 : i32
    return %c0_i32, %c0_i32_0 : i32, i32
  }
  func.func @transform_3(%arg0: i32, %arg1: i32) -> (i32, i32) {
    %c0_i32 = arith.constant 0 : i32
    %c0_i32_0 = arith.constant 0 : i32
    return %arg0, %c0_i32 : i32, i32
  }
  func.func @transform_4(%arg0: i32, %arg1: i32) -> (i32, i32) {
    %c0_i32 = arith.constant 0 : i32
    %c0_i32_0 = arith.constant 0 : i32
    %c0_i32_1 = arith.constant 0 : i32
    return %c0_i32, %c0_i32_0 : i32, i32
  }
  func.func @transform_5(%arg0: i32, %arg1: i32) -> (i32, i32) {
    %c0_i32 = arith.constant 0 : i32
    %c0_i32_0 = arith.constant 0 : i32
    %c0_i32_1 = arith.constant 0 : i32
    return %c0_i32, %c0_i32_0 : i32, i32
  }
  func.func @transform_6(%arg0: i32, %arg1: i32) -> (i32, i32) {
    %c0_i32 = arith.constant 0 : i32
    %c0_i32_0 = arith.constant 0 : i32
    return %arg0, %c0_i32 : i32, i32
  }
}

</mosaic_0001>

<bundles_post_ra>
// kernel: tpu_custom_call.1
= control target key start
LH: loop header
LB: loop body
LE: loop exit
PB: predicated region body
PF: predicated region fallthrough
CT: control target
= control target key end

     0   :  { %s2938_s0 = inlined_call_operand.hbm [shape: bf16[128,1024], index: 0, kind: input, shape index: {}]   ;;  %s2939_s1 = inlined_call_operand.hbm [shape: bf16[1024,256], index: 1, kind: input, shape index: {}]   ;;  %s2940_s2 = inlined_call_operand.vmem [shape: f32[1,256], index: 2, kind: input, shape index: {}]   ;;  %s2941_s3 = inlined_call_operand.hbm [shape: f32[128,256], index: 3, kind: input, shape index: {}]   ;;  %s2942_s4 = inlined_call_operand.hbm [shape: bf16[256,128], index: 4, kind: input, shape index: {}]   ;;  %s2943_s5 = inlined_call_operand.vmem [shape: f32[1,128], index: 5, kind: input, shape index: {}]   ;;  %s2944_s6 = inlined_call_operand.hbm [shape: f32[128,128], index: 6, kind: output, shape index: {}]  }
   0x1   :  { %2948 = sst [smem:[#allocation18_spill]] %s2938_s0 }
   0x2   :  { %2949 = sst [smem:[#allocation19_spill]] %s2941_s3 }
   0x3   :  { %2950 = sst [smem:[#allocation20_spill]] %s2942_s4 }
   0x4   :  { %2951 = sst [smem:[#allocation21_spill]] %s2943_s5 }
   0x5   :  { %2952 = sst [smem:[#allocation22_spill]] %s2944_s6 }
   0x6   :  { %11 = vsyncpa [#allocation4], 0 }
   0x7   :  { %13 = vsyncpa [#allocation4 + $0x1], 0 }
   0x8   :  { %14 = vsyncpa [#allocation7], 0 }
   0x9   :  { %16 = vsyncpa [#allocation7 + $0x1], 0 }
   0xa   :  { %17 = vsyncpa [#allocation10], 0 }
   0xb   :  { %18 = vsyncpa [#allocation5], 0  ;;  %s2586_s21 = smov 0   ;;  %s2588_s22 = smov 0  }
   0xc   :  { %s2590_s23 = smov 0   ;;  %s2592_s24 = smov 0  }
   0xd   :  { %s2594_s25 = smov 0   ;;  %s2596_s26 = smov 0  }
   0xe LB: > { %s2615_s27 = sadd.s32 4294967295, %s2534_s26   ;;  %p52_p0 = scmp.ne.s32.totalorder %s2522_s23, %s2518_s22  ;;  %s2534_s26 = sphi %s2596_s26, %s24_s26   ;;  %s2530_s25 = sphi %s2594_s25, %s2976_s25   ;;  %s2526_s24 = sphi %s2592_s24, %s2975_s24   ;;  %s2522_s23 = sphi %s2590_s23, %s2974_s23   ;;  %s2518_s22 = sphi %s2588_s22, %s2973_s22   ;;  %s2514_s21 = sphi %s2586_s21, %s2972_s21  }
   0xf   : > { %p53_p1 = scmp.eq.s32.totalorder %s2534_s26, 0  ;;  %p58_p2 = scmp.ne.s32.totalorder %s2518_s22, %s2514_s21 }
  0x10   : > { %p2945_p3 = scmp.eq.s32.totalorder %s2615_s27, 0  ;;  %p1860_p5 = scmp.ge.s32.totalorder %s2534_s26, 1 }
  0x11   : > { %p54_p4 = por %p53_p1, %p52_p0  ;;  %p210_p7 = scmp.lt.s32.totalorder %s2534_s26, 3 }
  0x12   : > { %p2626_p6 = por %p2945_p3, %p58_p2  ;;  %s2536_s7 = smov [#allocation8]  }
  0x13   : > { %p2631_p8 = pnand %p1860_p5, %p210_p7  ;;  %s229_s8 = sshll.u32 %s2536_s7, 4  ;;  %s230_s8 = int_to_ptr.vmem [resolvable:$true] %s229_s8 }
  0x14   : > { %p2110_p10 = scmp.lt.s32.totalorder %s2534_s26, 2  ;;  %s2537_s11 = smov [#allocation9]  }
  0x15   : > { %p2094_p9 = pneg %p2631_p8  ;;  %s242_s12 = sshll.u32 %s2537_s11, 4  ;;  %s243_s12 = int_to_ptr.vmem [resolvable:$true] %s242_s12 }
  0x16   : > { %p2644_p12 = pnand %p2110_p10, %p54_p4  ;;  %s2347_s13 = scalar_lea.vmem %s230_s8, 4096 }
  0x17   : > { %p2640_p11 = pnand %p2094_p9, %p2945_p3  ;;  %p2348_p0 = scmp.ne.s32.totalorder %s230_s8, %s2347_s13 }
  0x18   : > { %p2355_p5 = scmp.lt.s32.totalorder %s230_s8, %s230_s8  ;;  %p2356_p7 = scmp.lt.s32.totalorder %s2347_s13, %s2347_s13 }
  0x19   : > { %p2338_p13 = pneg %p2640_p11 }
  0x1a   : > { %p2357_p9 = por %p2356_p7, %p2355_p5 }
  0x1b   : > { %p2350_p1 = pnand %p2348_p0, %p2338_p13 }
  0x1d   : > { %p2351_p2 = pneg %p2350_p1 }
  0x1f   : > { %p2358_p3 = pnand %p2357_p9, %p2351_p2 }
  0x21   : > { %2361 = shalt.err (!%p2358_p3)
}
  0x22   : > { %s2946_s14 = smov 256   ;;  %s2539_s15 = smov 16  }
  0x23   : > { %s2957_s3 = sld [smem:[#allocation19_spill]]  ;;  %s2373_s18 = scalar_lea.vmem %s243_s12, 2048 }
  0x24   : > { %p2374_p4 = scmp.ne.s32.totalorder %s243_s12, %s2373_s18  ;;  %p2381_p1 = scmp.lt.s32.totalorder %s243_s12, %s243_s12 }
  0x25   : > { %p2382_p3 = scmp.lt.s32.totalorder %s2373_s18, %s2373_s18 }
  0x26   : > { %p2376_p10 = pnand %p2374_p4, %p2338_p13 }
  0x27   : > { %p2383_p2 = por %p2382_p3, %p2381_p1 }
  0x28   : > { %p2377_p0 = pneg %p2376_p10 }
  0x29   : > { %2097 = dma.hbm_to_vmem [thread:$0]  (!%p2640_p11), %s2957_s3, 4096, %s230_s8, [#allocation7], %s2946_s14, %s2946_s14, %s2539_s15  }
  0x2a   : > { %p2384_p5 = pnand %p2383_p2, %p2377_p0 }
  0x2c   : > { %2387 = shalt.err (!%p2384_p5)
}
  0x2d   : > { %s2540_s19 = smov 64   ;;  %s2541_s20 = smov 4  }
  0x2e   : > { %s2958_s4 = sld [smem:[#allocation20_spill]]  ;;  %s2670_s8 = sand.u32 1, %s2522_s23  }
  0x2f   : > { %s33_s11 = sadd.s32 1, %s2530_s25  ;;  %s1864_s13 = sshll.u32 %s2670_s8, 8 }
  0x30   : > { %p34_p13 = scmp.ge.s32.totalorder %s33_s11, 2  ;;  %s1995_s16 = sshll.u32 %s2530_s25, 8 }
  0x31   : > { %s2960_s0 = sld [smem:[#allocation18_spill]]  ;;  %s263_s28 = scalar_lea.vmem [#allocation3], %s1864_s13 }
  0x32   : > { %s2978_s11 = smov (%p34_p13, %s33_s11), 0  ;;  %s273_s14 = sshll.u32 %s263_s28, 4  ;;  %s274_s14 = int_to_ptr.vmem [resolvable:$true] %s273_s14 }
  0x33   : > { %2959 = sst [smem:[#allocation17_spill]] %s2978_s11  ;;  %s41_s21 = ssub.s32 %s2530_s25, %s2978_s11 }
  0x34   : > { %2100 = dma.hbm_to_vmem [thread:$0]  (!%p2640_p11), %s2958_s4, 2048, %s243_s12, [#allocation10], %s2540_s19, %s2540_s19, %s2541_s20  }
  0x35   : > { %p2682_p11 = scmp.eq.s32.totalorder %s41_s21, 0  ;;  %s260_s19 = scalar_lea.sflag [#allocation4], %s2670_s8 }
  0x36   : > { %p2390_p7 = pneg %p2644_p12  ;;  %s2401_s20 = scalar_lea.vmem %s274_s14, 4096 }
  0x37   : > { %s272_s9 = scalar_lea.hbm %s2960_s0, %s1995_s16  ;;  %p2402_p9 = scmp.ne.s32.totalorder %s274_s14, %s2401_s20 }
  0x38   : > { %s2542_s7 = smov [#allocation3]  }
  0x39   : > { %p2404_p4 = pnand %p2402_p9, %p2390_p7  ;;  %s2406_s17 = sshll.u32 %s2542_s7, 4  ;;  %s2407_s17 = int_to_ptr.vmem [resolvable:$false] %s2406_s17 }
  0x3a   : > { %s2408_s13 = scalar_lea.vmem %s2407_s17, 8192  ;;  %p2409_p0 = scmp.lt.s32.totalorder %s274_s14, %s2407_s17 }
  0x3b   : > { %p2405_p10 = pneg %p2404_p4  ;;  %p2410_p1 = scmp.lt.s32.totalorder %s2408_s13, %s2401_s20 }
  0x3d   : > { %p2411_p3 = por %p2410_p1, %p2409_p0 }
  0x3f   : > { %p2412_p2 = pnand %p2411_p3, %p2405_p10 }
  0x41   : > { %2415 = shalt.err (!%p2412_p2)
}
  0x42   : > { %s2543_s28 = smov 512   ;;  %s2962_s16 = smov 256  }
  0x43   : > { %2104 = dma.hbm_to_vmem [thread:$0]  (!%p2644_p12), %s272_s9, 4096, %s274_s14, %s260_s19, %s2543_s28, %s2962_s16, %s2539_s15  }
  0x44   : > { %s2963_s18 = sadd.s32 1, %s2522_s23  ;;  %s283_s20 = sand.u32 1, %s2534_s26  }
  0x45   : > { %s2701_s21 = scalar_select %p2682_p11, %s2522_s23, %s2963_s18  }
  0x46   : > { %s1867_s7 = sshll.u32 %s2670_s8, 9  ;;  %s1997_s17 = sshll.u32 %s2530_s25, 13 }
  0x47   : > { %s287_s13 = scalar_lea.vmem [#allocation6], %s1867_s7  ;;  %s294_s11 = scalar_lea.hbm %s2939_s1, %s1997_s17 }
  0x48   : > { %s295_s0 = sshll.u32 %s287_s13, 4  ;;  %s284_s6 = scalar_lea.sflag [#allocation7], %s283_s20  ;;  %s296_s0 = int_to_ptr.vmem [resolvable:$true] %s295_s0 }
  0x49   : > { %s2429_s5 = scalar_lea.vmem %s296_s0, 8192  ;;  %s2544_s14 = smov [#allocation6]  }
  0x4a   : > { %p2430_p5 = scmp.ne.s32.totalorder %s296_s0, %s2429_s5  ;;  %s2434_s15 = sshll.u32 %s2544_s14, 4  ;;  %s2435_s15 = int_to_ptr.vmem [resolvable:$false] %s2434_s15 }
  0x4b   : > { %s2436_s9 = scalar_lea.vmem %s2435_s15, 16384  ;;  %p2437_p11 = scmp.lt.s32.totalorder %s296_s0, %s2435_s15 }
  0x4c   : > { %p2432_p13 = pnand %p2430_p5, %p2390_p7  ;;  %p2438_p4 = scmp.lt.s32.totalorder %s2436_s9, %s2429_s5 }
  0x4e   : > { %p2433_p9 = pneg %p2432_p13  ;;  %p2439_p10 = por %p2438_p4, %p2437_p11 }
  0x50   : > { %p2440_p0 = pnand %p2439_p10, %p2433_p9 }
  0x52   : > { %2443 = shalt.err (!%p2440_p0)
}
  0x53   : > { %s2545_s8 = smov 128   ;;  %s2546_s3 = smov 8  }
  0x54   : > { %2107 = dma.hbm_to_vmem [thread:$0]  (!%p2644_p12), %s294_s11, 8192, %s296_s0, %s284_s6, %s2545_s8, %s2545_s8, %s2546_s3  }
  0x55   : > { %307 = sbr.rel (%p2631_p8) target bundleno = 733 (0x2dd), region = 44  ;;  %s309_s4 = sand.u32 (!%p2631_p8), 1, %s2518_s22  }
  0x56   : > { %s1872_s12 = sshll.u32 (!%p2631_p8), %s309_s4, 8  ;;  %s310_s19 = scalar_lea.sflag (!%p2631_p8), [#allocation4], %s309_s4 }
  0x57   : > { %s2717_s28 = scalar_lea.vmem (!%p2631_p8), [#allocation3], %s1872_s12 }
  0x5a   : > { %2493 = dma.done.wait (%p2626_p6), %s310_s19, 4096  }
  0x5b   : > { %2495 = vsyncadd (%p2626_p6), %s310_s19, 4294963200  ;;  %s318_s5 = sand.u32 1, %s2615_s27   ;;  %s1873_s10 = sshll.u32 %s309_s4, 9 }
  0x5c   : > { %s319_s0 = scalar_lea.sflag [#allocation7], %s318_s5  ;;  %s2724_s6 = scalar_lea.vmem [#allocation6], %s1873_s10 }
  0x5d   : > { %2497 = dma.done.wait (%p2626_p6), %s319_s0, 8192  }
  0x5e   : > { %2499 = vsyncadd (%p2626_p6), %s319_s0, 4294959104  ;;  %p2964_p8 = scmp.eq.s32.totalorder %s2615_s27, 0 }
  0x60   : > { %2501 = dma.done.wait (%p2964_p8), [#allocation7], 4096   ;;  %p2965_p12 = pmov %p2964_p8 }
  0x61   : > { %p2966_p7 = pmov %p2964_p8 }
  0x62   : > { %2503 = vsyncadd (%p2965_p12), [#allocation7], 4294963200 }
  0x63   : > { %2505 = dma.done.wait (%p2966_p7), [#allocation10], 2048   ;;  %p2967_p1 = pmov %p2966_p7 }
  0x64   : > { %p1876_p3 = scmp.ne.s32.totalorder %s2526_s24, 0 }
  0x65   : > { %2507 = vsyncadd (%p2967_p1), [#allocation10], 4294965248 }
  0x66   : > { %368 = sbr.rel (%p1876_p3) target bundleno = 124 (0x7c), region = 64 }
  0x6b   : > { %v2547_v0 = vmov 0.0  }
  0x6c   : > { %369 = vst [vmem:[#allocation2 + $0xb0] sm:$0xff] %v2547_v0  ;;  %370 = vst [vmem:[#allocation2] sm:$0xff] %v2547_v0 }
  0x6d   : > { %371 = vst [vmem:[#allocation2 + $0xd8] sm:$0xff] %v2547_v0  ;;  %372 = vst [vmem:[#allocation2 + $0x18] sm:$0xff] %v2547_v0 }
  0x6e   : > { %373 = vst [vmem:[#allocation2 + $0x50] sm:$0xff] %v2547_v0  ;;  %374 = vst [vmem:[#allocation2 + $0x68] sm:$0xff] %v2547_v0 }
  0x6f   : > { %375 = vst [vmem:[#allocation2 + $0x30] sm:$0xff] %v2547_v0  ;;  %376 = vst [vmem:[#allocation2 + $0x48] sm:$0xff] %v2547_v0 }
  0x70   : > { %377 = vst [vmem:[#allocation2 + $0x80] sm:$0xff] %v2547_v0  ;;  %378 = vst [vmem:[#allocation2 + $0x88] sm:$0xff] %v2547_v0 }
  0x71   : > { %379 = vst [vmem:[#allocation2 + $0xe8] sm:$0xff] %v2547_v0  ;;  %380 = vst [vmem:[#allocation2 + $0xb8] sm:$0xff] %v2547_v0 }
  0x72   : > { %381 = vst [vmem:[#allocation2 + $0x60] sm:$0xff] %v2547_v0  ;;  %382 = vst [vmem:[#allocation2 + $0xf0] sm:$0xff] %v2547_v0 }
  0x73   : > { %383 = vst [vmem:[#allocation2 + $0x8] sm:$0xff] %v2547_v0  ;;  %384 = vst [vmem:[#allocation2 + $0x78] sm:$0xff] %v2547_v0 }
  0x74   : > { %385 = vst [vmem:[#allocation2 + $0x38] sm:$0xff] %v2547_v0  ;;  %386 = vst [vmem:[#allocation2 + $0x58] sm:$0xff] %v2547_v0 }
  0x75   : > { %387 = vst [vmem:[#allocation2 + $0x40] sm:$0xff] %v2547_v0  ;;  %388 = vst [vmem:[#allocation2 + $0xc8] sm:$0xff] %v2547_v0 }
  0x76   : > { %389 = vst [vmem:[#allocation2 + $0xe0] sm:$0xff] %v2547_v0  ;;  %390 = vst [vmem:[#allocation2 + $0x90] sm:$0xff] %v2547_v0 }
  0x77   : > { %391 = vst [vmem:[#allocation2 + $0x70] sm:$0xff] %v2547_v0  ;;  %392 = vst [vmem:[#allocation2 + $0xc0] sm:$0xff] %v2547_v0 }
  0x78   : > { %393 = vst [vmem:[#allocation2 + $0xa8] sm:$0xff] %v2547_v0  ;;  %394 = vst [vmem:[#allocation2 + $0xd0] sm:$0xff] %v2547_v0 }
  0x79   : > { %395 = vst [vmem:[#allocation2 + $0x10] sm:$0xff] %v2547_v0  ;;  %396 = vst [vmem:[#allocation2 + $0x28] sm:$0xff] %v2547_v0 }
  0x7a   : > { %397 = vst [vmem:[#allocation2 + $0xa0] sm:$0xff] %v2547_v0  ;;  %398 = vst [vmem:[#allocation2 + $0xf8] sm:$0xff] %v2547_v0 }
  0x7b   : > { %399 = vst [vmem:[#allocation2 + $0x20] sm:$0xff] %v2547_v0  ;;  %400 = vst [vmem:[#allocation2 + $0x98] sm:$0xff] %v2547_v0 }
  0x7c PF: > { %v2176_v1 = vld [vmem:[%s2724_s6 + $0x74] ss:$8 sps:$4 sm:$0xff]   ;;  %v2180_v3 = vld [vmem:[%s2724_s6 + $0x70] ss:$8 sps:$4 sm:$0xff]   ;;  %v2182_v5 = vld [vmem:[%s2724_s6 + $0x64] ss:$8 sps:$4 sm:$0xff]  }
  0x7d   : > { %v2178_v2 = vld [vmem:[%s2724_s6 + $0x174] ss:$8 sps:$4 sm:$0xff]   ;;  %1009 = vmatprep.subr.bf16.mxu0 %v2176_v1  ;;  %v2181_v4 = vld [vmem:[%s2724_s6 + $0x170] ss:$8 sps:$4 sm:$0xff]   ;;  %v2184_v6 = vld [vmem:[%s2724_s6 + $0x164] ss:$8 sps:$4 sm:$0xff]  }
  0x7e   : > { %1122 = vmatprep.subr.bf16.mxu1 %v2178_v2  ;;  %1010 = vmatpush1.bf16.msra.mxu0 %v2180_v3  ;;  %v2186_v7 = vld [vmem:[%s2724_s6 + $0x60] ss:$8 sps:$4 sm:$0xff]   ;;  %v2188_v9 = vld [vmem:[%s2724_s6 + $0x54] ss:$8 sps:$4 sm:$0xff]   ;;  %v2192_v11 = vld [vmem:[%s2724_s6 + $0x50] ss:$8 sps:$4 sm:$0xff]  }
  0x7f   : > { %1123 = vmatpush1.bf16.msra.mxu1 %v2181_v4  ;;  %1011 = vmatprep.subr.bf16.mxu0 %v2182_v5  ;;  %v2187_v8 = vld [vmem:[%s2724_s6 + $0x160] ss:$8 sps:$4 sm:$0xff]   ;;  %v2190_v10 = vld [vmem:[%s2724_s6 + $0x154] ss:$8 sps:$4 sm:$0xff]   ;;  %v2193_v12 = vld [vmem:[%s2724_s6 + $0x150] ss:$8 sps:$4 sm:$0xff]  }
  0x80   : > { %1124 = vmatprep.subr.bf16.mxu1 %v2184_v6  ;;  %v2194_v13 = vld [vmem:[%s2724_s6 + $0x44] ss:$8 sps:$4 sm:$0xff]   ;;  %v2198_v15 = vld [vmem:[%s2724_s6 + $0x40] ss:$8 sps:$4 sm:$0xff]   ;;  %v2200_v17 = vld [vmem:[%s2724_s6 + $0x34] ss:$8 sps:$4 sm:$0xff]  }
  0x81   : > { %v2196_v14 = vld [vmem:[%s2724_s6 + $0x144] ss:$8 sps:$4 sm:$0xff]   ;;  %v2199_v16 = vld [vmem:[%s2724_s6 + $0x140] ss:$8 sps:$4 sm:$0xff]   ;;  %v2202_v18 = vld [vmem:[%s2724_s6 + $0x134] ss:$8 sps:$4 sm:$0xff]  }
  0x82   : > { %1012 = vmatpush1.bf16.msra.mxu0 %v2186_v7  ;;  %v2204_v19 = vld [vmem:[%s2724_s6 + $0x30] ss:$8 sps:$4 sm:$0xff]   ;;  %v2206_v21 = vld [vmem:[%s2724_s6 + $0x24] ss:$8 sps:$4 sm:$0xff]   ;;  %v2210_v23 = vld [vmem:[%s2724_s6 + $0x20] ss:$8 sps:$4 sm:$0xff]  }
  0x83   : > { %1125 = vmatpush1.bf16.msra.mxu1 %v2187_v8  ;;  %1013 = vmatprep.subr.bf16.mxu0 %v2188_v9  ;;  %v2205_v20 = vld [vmem:[%s2724_s6 + $0x130] ss:$8 sps:$4 sm:$0xff]   ;;  %v2208_v22 = vld [vmem:[%s2724_s6 + $0x124] ss:$8 sps:$4 sm:$0xff]   ;;  %v2211_v24 = vld [vmem:[%s2724_s6 + $0x120] ss:$8 sps:$4 sm:$0xff]  }
  0x84   : > { %1126 = vmatprep.subr.bf16.mxu1 %v2190_v10  ;;  %v2212_v25 = vld [vmem:[%s2724_s6 + $0x14] ss:$8 sps:$4 sm:$0xff]   ;;  %v2216_v27 = vld [vmem:[%s2724_s6 + $0x10] ss:$8 sps:$4 sm:$0xff]   ;;  %v2218_v29 = vld [vmem:[%s2724_s6 + $0x4] ss:$8 sps:$4 sm:$0xff]  }
  0x85   : > { %v2214_v26 = vld [vmem:[%s2724_s6 + $0x114] ss:$8 sps:$4 sm:$0xff]   ;;  %v2217_v28 = vld [vmem:[%s2724_s6 + $0x110] ss:$8 sps:$4 sm:$0xff]   ;;  %v2220_v30 = vld [vmem:[%s2724_s6 + $0x104] ss:$8 sps:$4 sm:$0xff]  }
  0x86   : > { %1014 = vmatpush1.bf16.msra.mxu0 %v2192_v11  ;;  %v2222_v31 = vld [vmem:[%s2724_s6] ss:$8 sps:$4 sm:$0xff]   ;;  %v2224_v33 = vld [vmem:[%s2724_s6 + $0xf4] ss:$8 sps:$4 sm:$0xff]   ;;  %v2228_v35 = vld [vmem:[%s2724_s6 + $0xf0] ss:$8 sps:$4 sm:$0xff]  }
  0x87   : > { %1127 = vmatpush1.bf16.msra.mxu1 %v2193_v12  ;;  %1015 = vmatprep.subr.bf16.mxu0 %v2194_v13  ;;  %v2223_v32 = vld [vmem:[%s2724_s6 + $0x100] ss:$8 sps:$4 sm:$0xff]   ;;  %v2226_v34 = vld [vmem:[%s2724_s6 + $0x1f4] ss:$8 sps:$4 sm:$0xff]   ;;  %v2229_v36 = vld [vmem:[%s2724_s6 + $0x1f0] ss:$8 sps:$4 sm:$0xff]  }
  0x88   : > { %1128 = vmatprep.subr.bf16.mxu1 %v2196_v14  ;;  %v2230_v37 = vld [vmem:[%s2724_s6 + $0xe4] ss:$8 sps:$4 sm:$0xff]   ;;  %v2234_v39 = vld [vmem:[%s2724_s6 + $0xe0] ss:$8 sps:$4 sm:$0xff]   ;;  %v2236_v41 = vld [vmem:[%s2724_s6 + $0xd4] ss:$8 sps:$4 sm:$0xff]  }
  0x89   : > { %v2232_v38 = vld [vmem:[%s2724_s6 + $0x1e4] ss:$8 sps:$4 sm:$0xff]   ;;  %v2235_v40 = vld [vmem:[%s2724_s6 + $0x1e0] ss:$8 sps:$4 sm:$0xff]   ;;  %v2238_v42 = vld [vmem:[%s2724_s6 + $0x1d4] ss:$8 sps:$4 sm:$0xff]  }
  0x8a   : > { %1016 = vmatpush1.bf16.msra.mxu0 %v2198_v15  ;;  %v2240_v43 = vld [vmem:[%s2724_s6 + $0xd0] ss:$8 sps:$4 sm:$0xff]   ;;  %v2242_v45 = vld [vmem:[%s2724_s6 + $0xc4] ss:$8 sps:$4 sm:$0xff]   ;;  %v2246_v47 = vld [vmem:[%s2724_s6 + $0xc0] ss:$8 sps:$4 sm:$0xff]  }
  0x8b   : > { %1129 = vmatpush1.bf16.msra.mxu1 %v2199_v16  ;;  %1017 = vmatprep.subr.bf16.mxu0 %v2200_v17  ;;  %v2241_v44 = vld [vmem:[%s2724_s6 + $0x1d0] ss:$8 sps:$4 sm:$0xff]   ;;  %v2244_v46 = vld [vmem:[%s2724_s6 + $0x1c4] ss:$8 sps:$4 sm:$0xff]   ;;  %v2247_v48 = vld [vmem:[%s2724_s6 + $0x1c0] ss:$8 sps:$4 sm:$0xff]  }
  0x8c   : > { %1130 = vmatprep.subr.bf16.mxu1 %v2202_v18  ;;  %v2248_v49 = vld [vmem:[%s2724_s6 + $0xb4] ss:$8 sps:$4 sm:$0xff]   ;;  %v2252_v53 = vld [vmem:[%s2724_s6 + $0xb0] ss:$8 sps:$4 sm:$0xff]   ;;  %v2254_v55 = vld [vmem:[%s2724_s6 + $0xa4] ss:$8 sps:$4 sm:$0xff]  }
  0x8d   : > { %v2274_v50 = vld [vmem:[%s2717_s28 + $0x4] ss:$16 sps:$4 sm:$0xff]   ;;  %v2277_v52 = vld [vmem:[%s2717_s28 + $0xc] ss:$16 sps:$4 sm:$0xff]   ;;  %v2253_v54 = vld [vmem:[%s2724_s6 + $0x1b0] ss:$8 sps:$4 sm:$0xff]  }
  0x8e   : > { %1018 = vmatpush1.bf16.msra.mxu0 %v2204_v19  ;;  %v2250_v51 = vld [vmem:[%s2724_s6 + $0x1b4] ss:$8 sps:$4 sm:$0xff]   ;;  %1041 = vmatprep.mubr.bf16.mxu0 %v2274_v50  ;;  %v2256_v56 = vld [vmem:[%s2724_s6 + $0x1a4] ss:$8 sps:$4 sm:$0xff]   ;;  %v2258_v57 = vld [vmem:[%s2724_s6 + $0xa0] ss:$8 sps:$4 sm:$0xff]  }
  0x8f   : > { %1131 = vmatpush1.bf16.msra.mxu1 %v2205_v20  ;;  %1019 = vmatprep.subr.bf16.mxu0 %v2206_v21  ;;  %v2259_v58 = vld [vmem:[%s2724_s6 + $0x1a0] ss:$8 sps:$4 sm:$0xff]   ;;  %v2260_v59 = vld [vmem:[%s2724_s6 + $0x94] ss:$8 sps:$4 sm:$0xff]   ;;  %v2264_v61 = vld [vmem:[%s2724_s6 + $0x90] ss:$8 sps:$4 sm:$0xff]  }
  0x90   : > { %1132 = vmatprep.subr.bf16.mxu1 %v2208_v22  ;;  %1154 = vmatprep.mubr.bf16.mxu1 %v2277_v52  ;;  %v2262_v60 = vld [vmem:[%s2724_s6 + $0x194] ss:$8 sps:$4 sm:$0xff]   ;;  %v2265_v62 = vld [vmem:[%s2724_s6 + $0x190] ss:$8 sps:$4 sm:$0xff]   ;;  %v2266_v63 = vld [vmem:[%s2724_s6 + $0x84] ss:$8 sps:$4 sm:$0xff]  }
  0x91   : > { %v2268_v0 = vld [vmem:[%s2724_s6 + $0x184] ss:$8 sps:$4 sm:$0xff]   ;;  %v2270_v1 = vld [vmem:[%s2724_s6 + $0x80] ss:$8 sps:$4 sm:$0xff]   ;;  %p1973_p6 = scmp.ne.s32.totalorder %s2526_s24, 1 }
  0x92   : > { %1020 = vmatpush1.bf16.msra.mxu0 %v2210_v23  ;;  %v2271_v2 = vld [vmem:[%s2724_s6 + $0x180] ss:$8 sps:$4 sm:$0xff]   ;;  %v2278_v5 = vld [vmem:[%s2717_s28 + $0x24] ss:$16 sps:$4 sm:$0xff]   ;;  %v2280_v6 = vld [vmem:[%s2717_s28 + $0x2c] ss:$16 sps:$4 sm:$0xff]  }
  0x93   : > { %1133 = vmatpush1.bf16.msra.mxu1 %v2211_v24  ;;  %1021 = vmatprep.subr.bf16.mxu0 %v2212_v25  ;;  %v2272_v3 = vld [vmem:[%s2717_s28] ss:$16 sps:$4 sm:$0xff]   ;;  %v2275_v4 = vld [vmem:[%s2717_s28 + $0x8] ss:$16 sps:$4 sm:$0xff]   ;;  %v2284_v9 = vld [vmem:[%s2717_s28 + $0x44] ss:$16 sps:$4 sm:$0xff]  }
  0x94   : > { %1134 = vmatprep.subr.bf16.mxu1 %v2214_v26  ;;  %v2282_v7 = vld [vmem:[%s2717_s28 + $0x20] ss:$16 sps:$4 sm:$0xff]   ;;  %v2283_v8 = vld [vmem:[%s2717_s28 + $0x28] ss:$16 sps:$4 sm:$0xff]   ;;  %v2286_v10 = vld [vmem:[%s2717_s28 + $0x4c] ss:$16 sps:$4 sm:$0xff]  }
  0x95   : > { %v2288_v11 = vld [vmem:[%s2717_s28 + $0x40] ss:$16 sps:$4 sm:$0xff]   ;;  %v2289_v12 = vld [vmem:[%s2717_s28 + $0x48] ss:$16 sps:$4 sm:$0xff]   ;;  %v2290_v13 = vld [vmem:[%s2717_s28 + $0x64] ss:$16 sps:$4 sm:$0xff]  }
  0x96   : > { %1022 = vmatpush1.bf16.msra.mxu0 %v2216_v27  ;;  %v2292_v14 = vld [vmem:[%s2717_s28 + $0x6c] ss:$16 sps:$4 sm:$0xff]   ;;  %v2294_v15 = vld [vmem:[%s2717_s28 + $0x60] ss:$16 sps:$4 sm:$0xff]   ;;  %v2295_v16 = vld [vmem:[%s2717_s28 + $0x68] ss:$16 sps:$4 sm:$0xff]  }
  0x97   : > { %1135 = vmatpush1.bf16.msra.mxu1 %v2217_v28  ;;  %1023 = vmatprep.subr.bf16.mxu0 %v2218_v29  ;;  %v2296_v17 = vld [vmem:[%s2717_s28 + $0x84] ss:$16 sps:$4 sm:$0xff]   ;;  %v2298_v18 = vld [vmem:[%s2717_s28 + $0x8c] ss:$16 sps:$4 sm:$0xff]   ;;  %v2300_v19 = vld [vmem:[%s2717_s28 + $0x80] ss:$16 sps:$4 sm:$0xff]  }
  0x98   : > { %1136 = vmatprep.subr.bf16.mxu1 %v2220_v30  ;;  %v2301_v20 = vld [vmem:[%s2717_s28 + $0x88] ss:$16 sps:$4 sm:$0xff]   ;;  %v2302_v21 = vld [vmem:[%s2717_s28 + $0xa4] ss:$16 sps:$4 sm:$0xff]   ;;  %v2304_v22 = vld [vmem:[%s2717_s28 + $0xac] ss:$16 sps:$4 sm:$0xff]  }
  0x99   : > { %v2306_v23 = vld [vmem:[%s2717_s28 + $0xa0] ss:$16 sps:$4 sm:$0xff]   ;;  %v2307_v24 = vld [vmem:[%s2717_s28 + $0xa8] ss:$16 sps:$4 sm:$0xff]   ;;  %v2308_v25 = vld [vmem:[%s2717_s28 + $0xc4] ss:$16 sps:$4 sm:$0xff]  }
  0x9a   : > { %1024 = vmatpush1.bf16.msra.mxu0 %v2222_v31  ;;  %v2310_v26 = vld [vmem:[%s2717_s28 + $0xcc] ss:$16 sps:$4 sm:$0xff]   ;;  %v2312_v27 = vld [vmem:[%s2717_s28 + $0xc0] ss:$16 sps:$4 sm:$0xff]   ;;  %v2313_v28 = vld [vmem:[%s2717_s28 + $0xc8] ss:$16 sps:$4 sm:$0xff]  }
  0x9b   : > { %1137 = vmatpush1.bf16.msra.mxu1 %v2223_v32  ;;  %1025 = vmatprep.subr.bf16.mxu0 %v2224_v33  ;;  %v2314_v29 = vld [vmem:[%s2717_s28 + $0xe4] ss:$16 sps:$4 sm:$0xff]   ;;  %v2316_v30 = vld [vmem:[%s2717_s28 + $0xec] ss:$16 sps:$4 sm:$0xff]   ;;  %v2318_v31 = vld [vmem:[%s2717_s28 + $0xe0] ss:$16 sps:$4 sm:$0xff]  }
  0x9c   : > { %1138 = vmatprep.subr.bf16.mxu1 %v2226_v34  ;;  %v2319_v32 = vld [vmem:[%s2717_s28 + $0xe8] ss:$16 sps:$4 sm:$0xff]   ;;  %v401_v34 = vld [vmem:[#allocation2 + $0xb0] sm:$0xff]  ;;  %s2968_s16 = sld [smem:[#allocation21_spill]] (!%p1973_p6) }
  0x9e   : > { %1026 = vmatpush2.bf16.msra.mxu0 %v2228_v35 }
  0x9f   : > { %1139 = vmatpush2.bf16.msra.mxu1 %v2229_v36  ;;  %1027 = vmatprep.subr.bf16.mxu0 %v2230_v37 }
  0xa0   : > { %1140 = vmatprep.subr.bf16.mxu1 %v2232_v38  ;;  %v402_v38 = vld [vmem:[#allocation2] sm:$0xff] }
  0xa2   : > { %1028 = vmatpush2.bf16.msra.mxu0 %v2234_v39 }
  0xa3   : > { %1141 = vmatpush2.bf16.msra.mxu1 %v2235_v40  ;;  %1029 = vmatprep.subr.bf16.mxu0 %v2236_v41 }
  0xa4   : > { %1142 = vmatprep.subr.bf16.mxu1 %v2238_v42 }
  0xa6   : > { %1030 = vmatpush2.bf16.msra.mxu0 %v2240_v43  ;;  %v403_v43 = vld [vmem:[#allocation2 + $0xd8] sm:$0xff] }
  0xa7   : > { %1143 = vmatpush2.bf16.msra.mxu1 %v2241_v44  ;;  %1031 = vmatprep.subr.bf16.mxu0 %v2242_v45 }
  0xa8   : > { %1144 = vmatprep.subr.bf16.mxu1 %v2244_v46 }
  0xaa   : > { %1032 = vmatpush2.bf16.msra.mxu0 %v2246_v47 }
  0xab   : > { %1145 = vmatpush2.bf16.msra.mxu1 %v2247_v48  ;;  %1033 = vmatprep.subr.bf16.mxu0 %v2248_v49  ;;  %v404_v48 = vld [vmem:[#allocation2 + $0x18] sm:$0xff] }
  0xac   : > { %1146 = vmatprep.subr.bf16.mxu1 %v2250_v51 }
  0xae   : > { %1034 = vmatpush2.bf16.msra.mxu0 %v2252_v53  ;;  %v405_v53 = vld [vmem:[#allocation2 + $0x50] sm:$0xff] }
  0xaf   : > { %1147 = vmatpush2.bf16.msra.mxu1 %v2253_v54  ;;  %1035 = vmatprep.subr.bf16.mxu0 %v2254_v55 }
  0xb0   : > { %1148 = vmatprep.subr.bf16.mxu1 %v2256_v56 }
  0xb2   : > { %1036 = vmatpush2.bf16.msra.mxu0 %v2258_v57 }
  0xb3   : > { %1149 = vmatpush2.bf16.msra.mxu1 %v2259_v58  ;;  %1037 = vmatprep.subr.bf16.mxu0 %v2260_v59  ;;  %v406_v58 = vld [vmem:[#allocation2 + $0x68] sm:$0xff] }
  0xb4   : > { %1150 = vmatprep.subr.bf16.mxu1 %v2262_v60 }
  0xb6   : > { %1038 = vmatpush2.bf16.msra.mxu0 %v2264_v61 }
  0xb7   : > { %1151 = vmatpush2.bf16.msra.mxu1 %v2265_v62  ;;  %1039 = vmatprep.subr.bf16.mxu0 %v2266_v63  ;;  %v407_v63 = vld [vmem:[#allocation2 + $0x30] sm:$0xff] }
  0xb8   : > { %1152 = vmatprep.subr.bf16.mxu1 %v2268_v0 }
  0xba   : > { %1040 = vmatpush2.bf16.msra.mxu0 %v2270_v1 }
  0xbb   : > { %1153 = vmatpush2.bf16.msra.mxu1 %v2271_v2 }
  0xbd   : > { %1042 = vmatmul.mubr.bf16.vlgmr.msra.gmra.mxu0 %v2272_v3 }
  0xbe   : > { %1155 = vmatmul.mubr.bf16.vlgmr.msra.gmra.mxu1 %v2275_v4  ;;  %1051 = vmatprep.mubr.bf16.mxu0 %v2278_v5  ;;  %v408_v4 = vld [vmem:[#allocation2 + $0x48] sm:$0xff] }
  0xbf   : > { %1164 = vmatprep.mubr.bf16.mxu1 %v2280_v6 }
  0xc5   : > { %1052 = vmatmul.mubr.bf16.gmra.mxu0 %v2282_v7 }
  0xc6   : > { %1165 = vmatmul.mubr.bf16.gmra.mxu1 %v2283_v8  ;;  %1061 = vmatprep.mubr.bf16.mxu0 %v2284_v9  ;;  %v409_v9 = vld [vmem:[#allocation2 + $0x80] sm:$0xff] }
  0xc7   : > { %1174 = vmatprep.mubr.bf16.mxu1 %v2286_v10 }
  0xcd   : > { %1062 = vmatmul.mubr.bf16.gmra.mxu0 %v2288_v11 }
  0xce   : > { %1175 = vmatmul.mubr.bf16.gmra.mxu1 %v2289_v12  ;;  %1071 = vmatprep.mubr.bf16.mxu0 %v2290_v13 }
  0xcf   : > { %1184 = vmatprep.mubr.bf16.mxu1 %v2292_v14  ;;  %v410_v14 = vld [vmem:[#allocation2 + $0x88] sm:$0xff] }
  0xd5   : > { %1072 = vmatmul.mubr.bf16.gmra.mxu0 %v2294_v15 }
  0xd6   : > { %1185 = vmatmul.mubr.bf16.gmra.mxu1 %v2295_v16  ;;  %1081 = vmatprep.mubr.bf16.mxu0 %v2296_v17 }
  0xd7   : > { %1194 = vmatprep.mubr.bf16.mxu1 %v2298_v18 }
  0xdd   : > { %1082 = vmatmul.mubr.bf16.gmra.mxu0 %v2300_v19  ;;  %v411_v19 = vld [vmem:[#allocation2 + $0xe8] sm:$0xff] }
  0xde   : > { %1195 = vmatmul.mubr.bf16.gmra.mxu1 %v2301_v20  ;;  %1091 = vmatprep.mubr.bf16.mxu0 %v2302_v21 }
  0xdf   : > { %1204 = vmatprep.mubr.bf16.mxu1 %v2304_v22 }
  0xe5   : > { %1092 = vmatmul.mubr.bf16.gmra.mxu0 %v2306_v23 }
  0xe6   : > { %1205 = vmatmul.mubr.bf16.gmra.mxu1 %v2307_v24  ;;  %1101 = vmatprep.mubr.bf16.mxu0 %v2308_v25  ;;  %v412_v24 = vld [vmem:[#allocation2 + $0xb8] sm:$0xff] }
  0xe7   : > { %1214 = vmatprep.mubr.bf16.mxu1 %v2310_v26 }
  0xed   : > { %1102 = vmatmul.mubr.bf16.gmra.mxu0 %v2312_v27 }
  0xee   : > { %1215 = vmatmul.mubr.bf16.gmra.mxu1 %v2313_v28  ;;  %1111 = vmatprep.mubr.bf16.mxu0 %v2314_v29  ;;  %v413_v29 = vld [vmem:[#allocation2 + $0x60] sm:$0xff] }
  0xef   : > { %1224 = vmatprep.mubr.bf16.mxu1 %v2316_v30 }
  0xf5   : > { %1112 = vmatmul.mubr.bf16.gmra.mxu0 %v2318_v31 }
  0xf6   : > { %1225 = vmatmul.mubr.bf16.gmra.mxu1 %v2319_v32 }
 0x17d   : > { %v1043_v33 = vpop.f32.mrf.mxu0 }
 0x17e   : > { %v1156_v35 = vpop.f32.mrf.mxu1 }
 0x17f   : > { %v1157_v36 = vadd.f32 %v1156_v35, %v1043_v33  ;;  %v1045_v37 = vpop.f32.mrf.mxu0 }
 0x180   : > { %v1158_v39 = vpop.f32.mrf.mxu1 }
 0x181   : > { %v1235_v40 = vadd.f32 %v1157_v36, %v401_v34  ;;  %v1159_v41 = vadd.f32 %v1158_v39, %v1045_v37  ;;  %v1047_v42 = vpop.f32.mrf.mxu0  ;;  %v414_v34 = vld [vmem:[#allocation2 + $0xf0] sm:$0xff]  ;;  %v415_v39 = vld [vmem:[#allocation2 + $0x8] sm:$0xff] }
 0x182   : > { %v1160_v44 = vpop.f32.mrf.mxu1 }
 0x183   : > { %1267 = vst [vmem:[#allocation2 + $0xb0] sm:$0xff] %v1235_v40  ;;  %v1236_v45 = vadd.f32 %v1159_v41, %v402_v38  ;;  %v1161_v46 = vadd.f32 %v1160_v44, %v1047_v42  ;;  %v1049_v47 = vpop.f32.mrf.mxu0  ;;  %v416_v44 = vld [vmem:[#allocation2 + $0x78] sm:$0xff] }
 0x184   : > { %v1162_v49 = vpop.f32.mrf.mxu1 }
 0x185   : > { %1268 = vst [vmem:[#allocation2] sm:$0xff] %v1236_v45  ;;  %v1237_v50 = vadd.f32 %v1161_v46, %v403_v43  ;;  %v1163_v51 = vadd.f32 %v1162_v49, %v1049_v47  ;;  %v1053_v52 = vpop.f32.mrf.mxu0  ;;  %v417_v49 = vld [vmem:[#allocation2 + $0x38] sm:$0xff] }
 0x186   : > { %v1166_v54 = vpop.f32.mrf.mxu1 }
 0x187   : > { %1269 = vst [vmem:[#allocation2 + $0xd8] sm:$0xff] %v1237_v50  ;;  %v1238_v55 = vadd.f32 %v1163_v51, %v404_v48  ;;  %v1167_v56 = vadd.f32 %v1166_v54, %v1053_v52  ;;  %v1055_v57 = vpop.f32.mrf.mxu0  ;;  %v418_v54 = vld [vmem:[#allocation2 + $0x58] sm:$0xff] }
 0x188   : > { %v1168_v59 = vpop.f32.mrf.mxu1 }
 0x189   : > { %1270 = vst [vmem:[#allocation2 + $0x18] sm:$0xff] %v1238_v55  ;;  %v1239_v60 = vadd.f32 %v1167_v56, %v405_v53  ;;  %v1169_v61 = vadd.f32 %v1168_v59, %v1055_v57  ;;  %v1057_v62 = vpop.f32.mrf.mxu0  ;;  %v419_v59 = vld [vmem:[#allocation2 + $0x40] sm:$0xff] }
 0x18a   : > { %v1170_v0 = vpop.f32.mrf.mxu1 }
 0x18b   : > { %1271 = vst [vmem:[#allocation2 + $0x50] sm:$0xff] %v1239_v60  ;;  %v1240_v1 = vadd.f32 %v1169_v61, %v406_v58  ;;  %v1171_v2 = vadd.f32 %v1170_v0, %v1057_v62  ;;  %v1059_v3 = vpop.f32.mrf.mxu0  ;;  %v420_v0 = vld [vmem:[#allocation2 + $0xc8] sm:$0xff] }
 0x18c   : > { %v1172_v5 = vpop.f32.mrf.mxu1 }
 0x18d   : > { %1272 = vst [vmem:[#allocation2 + $0x68] sm:$0xff] %v1240_v1  ;;  %v1241_v6 = vadd.f32 %v1171_v2, %v407_v63  ;;  %v1173_v7 = vadd.f32 %v1172_v5, %v1059_v3  ;;  %v1063_v8 = vpop.f32.mrf.mxu0  ;;  %v421_v5 = vld [vmem:[#allocation2 + $0xe0] sm:$0xff] }
 0x18e   : > { %v1176_v10 = vpop.f32.mrf.mxu1 }
 0x18f   : > { %1273 = vst [vmem:[#allocation2 + $0x30] sm:$0xff] %v1241_v6  ;;  %v1242_v11 = vadd.f32 %v1173_v7, %v408_v4  ;;  %v1177_v12 = vadd.f32 %v1176_v10, %v1063_v8  ;;  %v1065_v13 = vpop.f32.mrf.mxu0  ;;  %v422_v10 = vld [vmem:[#allocation2 + $0x90] sm:$0xff] }
 0x190   : > { %v1178_v15 = vpop.f32.mrf.mxu1 }
 0x191   : > { %1274 = vst [vmem:[#allocation2 + $0x48] sm:$0xff] %v1242_v11  ;;  %v1243_v16 = vadd.f32 %v1177_v12, %v409_v9  ;;  %v1179_v17 = vadd.f32 %v1178_v15, %v1065_v13  ;;  %v1067_v18 = vpop.f32.mrf.mxu0  ;;  %v423_v15 = vld [vmem:[#allocation2 + $0x70] sm:$0xff] }
 0x192   : > { %v1180_v20 = vpop.f32.mrf.mxu1 }
 0x193   : > { %1275 = vst [vmem:[#allocation2 + $0x80] sm:$0xff] %v1243_v16  ;;  %v1244_v21 = vadd.f32 %v1179_v17, %v410_v14  ;;  %v1181_v22 = vadd.f32 %v1180_v20, %v1067_v18  ;;  %v1069_v23 = vpop.f32.mrf.mxu0  ;;  %v424_v20 = vld [vmem:[#allocation2 + $0xc0] sm:$0xff] }
 0x194   : > { %v1182_v25 = vpop.f32.mrf.mxu1 }
 0x195   : > { %1276 = vst [vmem:[#allocation2 + $0x88] sm:$0xff] %v1244_v21  ;;  %v1245_v26 = vadd.f32 %v1181_v22, %v411_v19  ;;  %v1183_v27 = vadd.f32 %v1182_v25, %v1069_v23  ;;  %v1073_v28 = vpop.f32.mrf.mxu0  ;;  %v425_v25 = vld [vmem:[#allocation2 + $0xa8] sm:$0xff] }
 0x196   : > { %v1186_v30 = vpop.f32.mrf.mxu1 }
 0x197   : > { %1277 = vst [vmem:[#allocation2 + $0xe8] sm:$0xff] %v1245_v26  ;;  %v1246_v31 = vadd.f32 %v1183_v27, %v412_v24  ;;  %v1187_v32 = vadd.f32 %v1186_v30, %v1073_v28  ;;  %v1075_v33 = vpop.f32.mrf.mxu0  ;;  %v426_v30 = vld [vmem:[#allocation2 + $0xd0] sm:$0xff] }
 0x198   : > { %v1188_v35 = vpop.f32.mrf.mxu1 }
 0x199   : > { %1278 = vst [vmem:[#allocation2 + $0xb8] sm:$0xff] %v1246_v31  ;;  %v1247_v36 = vadd.f32 %v1187_v32, %v413_v29  ;;  %v1189_v37 = vadd.f32 %v1188_v35, %v1075_v33  ;;  %v1077_v38 = vpop.f32.mrf.mxu0  ;;  %v427_v35 = vld [vmem:[#allocation2 + $0x10] sm:$0xff] }
 0x19a   : > { %v1190_v40 = vpop.f32.mrf.mxu1 }
 0x19b   : > { %1279 = vst [vmem:[#allocation2 + $0x60] sm:$0xff] %v1247_v36  ;;  %v1248_v41 = vadd.f32 %v1189_v37, %v414_v34  ;;  %v1191_v42 = vadd.f32 %v1190_v40, %v1077_v38  ;;  %v1079_v43 = vpop.f32.mrf.mxu0  ;;  %v428_v40 = vld [vmem:[#allocation2 + $0x28] sm:$0xff] }
 0x19c   : > { %v1192_v45 = vpop.f32.mrf.mxu1 }
 0x19d   : > { %1280 = vst [vmem:[#allocation2 + $0xf0] sm:$0xff] %v1248_v41  ;;  %v1249_v46 = vadd.f32 %v1191_v42, %v415_v39  ;;  %v1193_v47 = vadd.f32 %v1192_v45, %v1079_v43  ;;  %v1083_v48 = vpop.f32.mrf.mxu0  ;;  %v429_v45 = vld [vmem:[#allocation2 + $0xa0] sm:$0xff] }
 0x19e   : > { %v1196_v50 = vpop.f32.mrf.mxu1 }
 0x19f   : > { %1281 = vst [vmem:[#allocation2 + $0x8] sm:$0xff] %v1249_v46  ;;  %v1250_v51 = vadd.f32 %v1193_v47, %v416_v44  ;;  %v1197_v52 = vadd.f32 %v1196_v50, %v1083_v48  ;;  %v1085_v53 = vpop.f32.mrf.mxu0  ;;  %v430_v50 = vld [vmem:[#allocation2 + $0xf8] sm:$0xff] }
 0x1a0   : > { %v1198_v55 = vpop.f32.mrf.mxu1 }
 0x1a1   : > { %1282 = vst [vmem:[#allocation2 + $0x78] sm:$0xff] %v1250_v51  ;;  %v1251_v56 = vadd.f32 %v1197_v52, %v417_v49  ;;  %v1199_v57 = vadd.f32 %v1198_v55, %v1085_v53  ;;  %v1087_v58 = vpop.f32.mrf.mxu0  ;;  %v431_v55 = vld [vmem:[#allocation2 + $0x20] sm:$0xff] }
 0x1a2   : > { %v1200_v60 = vpop.f32.mrf.mxu1 }
 0x1a3   : > { %1283 = vst [vmem:[#allocation2 + $0x38] sm:$0xff] %v1251_v56  ;;  %v1252_v61 = vadd.f32 %v1199_v57, %v418_v54  ;;  %v1201_v62 = vadd.f32 %v1200_v60, %v1087_v58  ;;  %v1089_v63 = vpop.f32.mrf.mxu0  ;;  %v432_v60 = vld [vmem:[#allocation2 + $0x98] sm:$0xff] }
 0x1a4   : > { %v1202_v1 = vpop.f32.mrf.mxu1 }
 0x1a5   : > { %1284 = vst [vmem:[#allocation2 + $0x58] sm:$0xff] %v1252_v61  ;;  %v1253_v2 = vadd.f32 %v1201_v62, %v419_v59  ;;  %v1203_v3 = vadd.f32 %v1202_v1, %v1089_v63  ;;  %v1093_v4 = vpop.f32.mrf.mxu0 }
 0x1a6   : > { %v1206_v6 = vpop.f32.mrf.mxu1 }
 0x1a7   : > { %1285 = vst [vmem:[#allocation2 + $0x40] sm:$0xff] %v1253_v2  ;;  %v1254_v7 = vadd.f32 %v1203_v3, %v420_v0  ;;  %v1207_v8 = vadd.f32 %v1206_v6, %v1093_v4  ;;  %v1095_v9 = vpop.f32.mrf.mxu0 }
 0x1a8   : > { %v1208_v11 = vpop.f32.mrf.mxu1 }
 0x1a9   : > { %1286 = vst [vmem:[#allocation2 + $0xc8] sm:$0xff] %v1254_v7  ;;  %v1255_v12 = vadd.f32 %v1207_v8, %v421_v5  ;;  %v1209_v13 = vadd.f32 %v1208_v11, %v1095_v9  ;;  %v1097_v14 = vpop.f32.mrf.mxu0 }
 0x1aa   : > { %v1210_v16 = vpop.f32.mrf.mxu1 }
 0x1ab   : > { %1287 = vst [vmem:[#allocation2 + $0xe0] sm:$0xff] %v1255_v12  ;;  %v1256_v17 = vadd.f32 %v1209_v13, %v422_v10  ;;  %v1211_v18 = vadd.f32 %v1210_v16, %v1097_v14  ;;  %v1099_v19 = vpop.f32.mrf.mxu0 }
 0x1ac   : > { %v1212_v21 = vpop.f32.mrf.mxu1 }
 0x1ad   : > { %1288 = vst [vmem:[#allocation2 + $0x90] sm:$0xff] %v1256_v17  ;;  %v1257_v22 = vadd.f32 %v1211_v18, %v423_v15  ;;  %v1213_v23 = vadd.f32 %v1212_v21, %v1099_v19  ;;  %v1103_v24 = vpop.f32.mrf.mxu0 }
 0x1ae   : > { %v1216_v26 = vpop.f32.mrf.mxu1 }
 0x1af   : > { %1289 = vst [vmem:[#allocation2 + $0x70] sm:$0xff] %v1257_v22  ;;  %v1258_v27 = vadd.f32 %v1213_v23, %v424_v20  ;;  %v1217_v28 = vadd.f32 %v1216_v26, %v1103_v24  ;;  %v1105_v29 = vpop.f32.mrf.mxu0 }
 0x1b0   : > { %v1218_v31 = vpop.f32.mrf.mxu1 }
 0x1b1   : > { %1290 = vst [vmem:[#allocation2 + $0xc0] sm:$0xff] %v1258_v27  ;;  %v1259_v32 = vadd.f32 %v1217_v28, %v425_v25  ;;  %v1219_v33 = vadd.f32 %v1218_v31, %v1105_v29  ;;  %v1107_v34 = vpop.f32.mrf.mxu0 }
 0x1b2   : > { %v1220_v36 = vpop.f32.mrf.mxu1 }
 0x1b3   : > { %1291 = vst [vmem:[#allocation2 + $0xa8] sm:$0xff] %v1259_v32  ;;  %v1260_v37 = vadd.f32 %v1219_v33, %v426_v30  ;;  %v1221_v38 = vadd.f32 %v1220_v36, %v1107_v34  ;;  %v1109_v39 = vpop.f32.mrf.mxu0 }
 0x1b4   : > { %v1222_v41 = vpop.f32.mrf.mxu1 }
 0x1b5   : > { %1292 = vst [vmem:[#allocation2 + $0xd0] sm:$0xff] %v1260_v37  ;;  %v1261_v42 = vadd.f32 %v1221_v38, %v427_v35  ;;  %v1223_v43 = vadd.f32 %v1222_v41, %v1109_v39  ;;  %v1113_v44 = vpop.f32.mrf.mxu0 }
 0x1b6   : > { %v1226_v46 = vpop.f32.mrf.mxu1 }
 0x1b7   : > { %1293 = vst [vmem:[#allocation2 + $0x10] sm:$0xff] %v1261_v42  ;;  %v1262_v47 = vadd.f32 %v1223_v43, %v428_v40  ;;  %v1227_v48 = vadd.f32 %v1226_v46, %v1113_v44  ;;  %v1115_v49 = vpop.f32.mrf.mxu0 }
 0x1b8   : > { %v1228_v51 = vpop.f32.mrf.mxu1 }
 0x1b9   : > { %1294 = vst [vmem:[#allocation2 + $0x28] sm:$0xff] %v1262_v47  ;;  %v1263_v52 = vadd.f32 %v1227_v48, %v429_v45  ;;  %v1229_v53 = vadd.f32 %v1228_v51, %v1115_v49  ;;  %v1117_v54 = vpop.f32.mrf.mxu0 }
 0x1ba   : > { %v1230_v56 = vpop.f32.mrf.mxu1 }
 0x1bb   : > { %1295 = vst [vmem:[#allocation2 + $0xa0] sm:$0xff] %v1263_v52  ;;  %v1264_v57 = vadd.f32 %v1229_v53, %v430_v50  ;;  %v1231_v58 = vadd.f32 %v1230_v56, %v1117_v54  ;;  %v1119_v59 = vpop.f32.mrf.mxu0 }
 0x1bc   : > { %v1232_v61 = vpop.f32.mrf.mxu1 }
 0x1bd   : > { %1296 = vst [vmem:[#allocation2 + $0xf8] sm:$0xff] %v1264_v57  ;;  %v1265_v62 = vadd.f32 %v1231_v58, %v431_v55  ;;  %v1233_v63 = vadd.f32 %v1232_v61, %v1119_v59  ;;  %1302 = sbr.rel (%p1973_p6) target bundleno = 711 (0x2c7), region = 68 }
 0x1bf   : > { %1297 = vst [vmem:[#allocation2 + $0x20] sm:$0xff] %v1265_v62  ;;  %v1266_v0 = vadd.f32 %v1233_v63, %v432_v60 }
 0x1c1   : > { %1298 = vst [vmem:[#allocation2 + $0x98] sm:$0xff] %v1266_v0 }
 0x1c2   : > { %v2320_v1 = vld [vmem:[#allocation9 + $0x78] sm:$0xff]   ;;  %v2322_v3 = vld [vmem:[#allocation9 + $0x70] sm:$0xff]   ;;  %v2324_v5 = vld [vmem:[#allocation9 + $0x68] sm:$0xff]   ;;  %v1337_v6 = vlaneseq }
 0x1c3   : > { %v2321_v2 = vld [vmem:[#allocation9 + $0x38] sm:$0xff]   ;;  %1998 = vmatprep.subr.bf16.mxu0 %v2320_v1  ;;  %2062 = vmatprep.subr.bf16.mxu1 %v2320_v1  ;;  %v2323_v4 = vld [vmem:[#allocation9 + $0x30] sm:$0xff]   ;;  %v2325_v7 = vld [vmem:[#allocation9 + $0x28] sm:$0xff]  }
 0x1c4   : > { %1999 = vmatpush3.bf16.msra.mxu0 %v2321_v2  ;;  %2070 = vmatpush3.bf16.msra.mxu1 %v2321_v2  ;;  %v2326_v8 = vld [vmem:[#allocation9 + $0x60] sm:$0xff]   ;;  %v1338_v9 = vshrl.u32 %v1337_v6, 7  ;;  %v2328_v11 = vld [vmem:[#allocation9 + $0x58] sm:$0xff]   ;;  %v2330_v15 = vld [vmem:[#allocation9 + $0x50] sm:$0xff]  }
 0x1c5   : > { %2000 = vmatprep.subr.bf16.mxu0 %v2322_v3  ;;  %2063 = vmatprep.subr.bf16.mxu1 %v2322_v3  ;;  %v2327_v10 = vld [vmem:[#allocation9 + $0x20] sm:$0xff]   ;;  %v2329_v14 = vld [vmem:[#allocation9 + $0x18] sm:$0xff]   ;;  %v2331_v19 = vld [vmem:[#allocation9 + $0x10] sm:$0xff]  }
 0x1c6   : > { %v1339_v12 = vsub.s32 0, %v1338_v9  ;;  %v1343_v13 = vsub.s32 1, %v1338_v9  ;;  %v1304_v16 = vld [vmem:[#allocation2] sm:$0xff]  ;;  %v1306_v17 = vld [vmem:[#allocation2 + $0x18] sm:$0xff]  ;;  %v2332_v23 = vld [vmem:[#allocation9 + $0x48] sm:$0xff]  }
 0x1c7   : > { %v1335_v18 = vld [vmem:[%s2940_s2] sm:$0x3]  ;;  %v1320_v22 = vld [vmem:[#allocation2 + $0x58] sm:$0xff]  ;;  %v1412_v24 = vld [vmem:[#allocation8 + $0x8] sm:$0xff] }
 0x1c8   : > { %2001 = vmatpush3.bf16.msra.mxu0 %v2323_v4  ;;  %2071 = vmatpush3.bf16.msra.mxu1 %v2323_v4  ;;  %v2839_v20 = vrot.slane %v1335_v18, %v1339_v12  ;;  %v2841_v21 = vrot.slane %v1335_v18, %v1343_v13  ;;  %v1322_v25 = vld [vmem:[#allocation2 + $0xc8] sm:$0xff]  ;;  %v1414_v28 = vld [vmem:[#allocation8 + $0x18] sm:$0xff]  ;;  %v1303_v30 = vld [vmem:[#allocation2 + $0xb0] sm:$0xff] }
 0x1c9   : > { %2002 = vmatprep.subr.bf16.mxu0 %v2324_v5  ;;  %2064 = vmatprep.subr.bf16.mxu1 %v2324_v5  ;;  %v1305_v31 = vld [vmem:[#allocation2 + $0xd8] sm:$0xff]  ;;  %v1428_v33 = vld [vmem:[#allocation8 + $0x88] sm:$0xff]  ;;  %v1321_v37 = vld [vmem:[#allocation2 + $0x40] sm:$0xff] }
 0x1ca   : > { %v1348_v26 = vadd.f32 %v2841_v21, %v1304_v16  ;;  %v1350_v27 = vadd.f32 %v2841_v21, %v1306_v17  ;;  %v1364_v29 = vadd.f32 %v2841_v21, %v1320_v22  ;;  %v1366_v32 = vadd.f32 %v2841_v21, %v1322_v25  ;;  %v1319_v36 = vld [vmem:[#allocation2 + $0x38] sm:$0xff]  ;;  %v1411_v42 = vld [vmem:[#allocation8] sm:$0xff]  ;;  %v1413_v43 = vld [vmem:[#allocation8 + $0x10] sm:$0xff] }
 0x1cb   : > { %v1347_v34 = vadd.f32 %v2839_v20, %v1303_v30  ;;  %v1349_v35 = vadd.f32 %v2839_v20, %v1305_v31  ;;  %v1430_v41 = vld [vmem:[#allocation8 + $0x98] sm:$0xff]  ;;  %v1363_v44 = vadd.f32 %v2839_v20, %v1319_v36  ;;  %v1365_v48 = vadd.f32 %v2839_v20, %v1321_v37  ;;  %v1427_v49 = vld [vmem:[#allocation8 + $0x80] sm:$0xff]  ;;  %v1308_v50 = vld [vmem:[#allocation2 + $0x68] sm:$0xff] }
 0x1cc   : > { %2003 = vmatpush3.bf16.msra.mxu0 %v2325_v7  ;;  %2072 = vmatpush3.bf16.msra.mxu1 %v2325_v7  ;;  %v1380_v38 = vmax.f32 %v1348_v26, 0.0  ;;  %v1382_v39 = vmax.f32 %v1350_v27, 0.0  ;;  %v1396_v40 = vmax.f32 %v1364_v29, 0.0  ;;  %v1398_v45 = vmax.f32 %v1366_v32, 0.0  ;;  %v1310_v51 = vld [vmem:[#allocation2 + $0x48] sm:$0xff]  ;;  %v1429_v57 = vld [vmem:[#allocation8 + $0x90] sm:$0xff] }
 0x1cd   : > { %2004 = vmatprep.subr.bf16.mxu0 %v2326_v8  ;;  %2065 = vmatprep.subr.bf16.mxu1 %v2326_v8  ;;  %v1379_v46 = vmax.f32 %v1347_v34, 0.0  ;;  %v1381_v47 = vmax.f32 %v1349_v35, 0.0  ;;  %v2333_v52 = vld [vmem:[#allocation9 + $0x8] sm:$0xff]   ;;  %v1395_v56 = vmax.f32 %v1363_v44, 0.0  ;;  %v1324_v58 = vld [vmem:[#allocation2 + $0x90] sm:$0xff]  ;;  %v2334_v59 = vld [vmem:[#allocation9 + $0x40] sm:$0xff]   ;;  %v1352_v4 = vadd.f32 %v2841_v21, %v1308_v50 }
 0x1ce   : > { %v1444_v53 = vmul.f32 %v1412_v24, %v1380_v38  ;;  %v1446_v54 = vmul.f32 %v1414_v28, %v1382_v39  ;;  %v1460_v55 = vmul.f32 %v1428_v33, %v1396_v40  ;;  %v1462_v60 = vmul.f32 %v1430_v41, %v1398_v45  ;;  %v1326_v0 = vld [vmem:[#allocation2 + $0xc0] sm:$0xff]  ;;  %v1307_v1 = vld [vmem:[#allocation2 + $0x50] sm:$0xff]  ;;  %v1418_v12 = vld [vmem:[#allocation8 + $0x38] sm:$0xff] }
 0x1cf   : > { %v2851_v61 = vmul.f32 %v1411_v42, %v1379_v46  ;;  %v2853_v62 = vmul.f32 %v1413_v43, %v1381_v47  ;;  %v1397_v63 = vmax.f32 %v1365_v48, 0.0  ;;  %v1459_v3 = vmul.f32 %v1427_v49, %v1395_v56  ;;  %v1309_v6 = vld [vmem:[#allocation2 + $0x30] sm:$0xff]  ;;  %v1323_v7 = vld [vmem:[#allocation2 + $0xe0] sm:$0xff]  ;;  %v1432_v18 = vld [vmem:[#allocation8 + $0xa8] sm:$0xff] }
 0x1d0   : > { %2005 = vmatpush3.bf16.msra.mxu0 %v2327_v10  ;;  %2073 = vmatpush3.bf16.msra.mxu1 %v2327_v10  ;;  %v1476_v2 = vpack.c.bf16 %v1446_v54, %v1444_v53  ;;  %v1354_v5 = vadd.f32 %v2841_v21, %v1310_v51  ;;  %v1484_v8 = vpack.c.bf16 %v1462_v60, %v1460_v55  ;;  %v1325_v22 = vld [vmem:[#allocation2 + $0x70] sm:$0xff]  ;;  %v1434_v25 = vld [vmem:[#allocation8 + $0xb8] sm:$0xff]  ;;  %v1415_v32 = vld [vmem:[#allocation8 + $0x20] sm:$0xff] }
 0x1d1   : > { %2006 = vmatprep.subr.bf16.mxu0 %v2328_v11  ;;  %2066 = vmatprep.subr.bf16.mxu1 %v2328_v11  ;;  %v1475_v9 = vpack.c.bf16 %v2853_v62, %v2851_v61  ;;  %v1461_v10 = vmul.f32 %v1429_v57, %v1397_v63  ;;  %v1416_v11 = vld [vmem:[#allocation8 + $0x28] sm:$0xff]  ;;  %v1368_v13 = vadd.f32 %v2841_v21, %v1324_v58  ;;  %v1417_v33 = vld [vmem:[#allocation8 + $0x30] sm:$0xff]  ;;  %v1314_v39 = vld [vmem:[#allocation2 + $0xb8] sm:$0xff] }
 0x1d2   : > { %v1386_v16 = vmax.f32 %v1354_v5, 0.0  ;;  %v1370_v17 = vadd.f32 %v2841_v21, %v1326_v0  ;;  %v1353_v26 = vadd.f32 %v2839_v20, %v1309_v6  ;;  %v1367_v27 = vadd.f32 %v2839_v20, %v1323_v7  ;;  %1658 = vmatprep.mubr.bf16.mxu0 %v1476_v2  ;;  %1690 = vmatprep.mubr.bf16.mxu1 %v1484_v8  ;;  %v1312_v34 = vld [vmem:[#allocation2 + $0x88] sm:$0xff]  ;;  %v1328_v40 = vld [vmem:[#allocation2 + $0xd0] sm:$0xff]  ;;  %v1431_v44 = vld [vmem:[#allocation8 + $0xa0] sm:$0xff] }
 0x1d3   : > { %v1400_v24 = vmax.f32 %v1368_v13, 0.0  ;;  %v1369_v37 = vadd.f32 %v2839_v20, %v1325_v22  ;;  %v1330_v41 = vld [vmem:[#allocation2 + $0x28] sm:$0xff]  ;;  %v1433_v45 = vld [vmem:[#allocation8 + $0xb0] sm:$0xff]  ;;  %v1311_v46 = vld [vmem:[#allocation2 + $0x80] sm:$0xff]  ;;  %v1356_v50 = vadd.f32 %v2841_v21, %v1312_v34  ;;  %v1358_v53 = vadd.f32 %v2841_v21, %v1314_v39 }
 0x1d4   : > { %2007 = vmatpush3.bf16.msra.mxu0 %v2329_v14  ;;  %2074 = vmatpush3.bf16.msra.mxu1 %v2329_v14  ;;  %v2335_v14 = vld [vmem:[#allocation9] sm:$0xff]   ;;  %v1450_v29 = vmul.f32 %v1418_v12, %v1386_v16  ;;  %v1402_v30 = vmax.f32 %v1370_v17, 0.0  ;;  %v1385_v36 = vmax.f32 %v1353_v26, 0.0  ;;  %v1399_v38 = vmax.f32 %v1367_v27, 0.0  ;;  %v1313_v51 = vld [vmem:[#allocation2 + $0xe8] sm:$0xff]  ;;  %v1422_v61 = vld [vmem:[#allocation8 + $0x58] sm:$0xff] }
 0x1d5   : > { %2008 = vmatprep.subr.bf16.mxu0 %v2330_v15  ;;  %2067 = vmatprep.subr.bf16.mxu1 %v2330_v15  ;;  %v1384_v15 = vmax.f32 %v1352_v4, 0.0  ;;  %v1464_v35 = vmul.f32 %v1432_v18, %v1400_v24  ;;  %v1401_v49 = vmax.f32 %v1369_v37, 0.0  ;;  %v1420_v54 = vld [vmem:[#allocation8 + $0x48] sm:$0xff]  ;;  %v1372_v55 = vadd.f32 %v2841_v21, %v1328_v40  ;;  %v1438_v63 = vld [vmem:[#allocation8 + $0xd8] sm:$0xff]  ;;  %v1329_v5 = vld [vmem:[#allocation2 + $0x10] sm:$0xff] }
 0x1d6   : > { %v1466_v43 = vmul.f32 %v1434_v25, %v1402_v30  ;;  %v2867_v48 = vmul.f32 %v1417_v33, %v1385_v36  ;;  %v1374_v56 = vadd.f32 %v2841_v21, %v1330_v41  ;;  %v1327_v57 = vld [vmem:[#allocation2 + $0xa8] sm:$0xff]  ;;  %v1463_v58 = vmul.f32 %v1431_v44, %v1399_v38  ;;  %v1316_v6 = vld [vmem:[#allocation2 + $0xf0] sm:$0xff]  ;;  %v1419_v16 = vld [vmem:[#allocation8 + $0x40] sm:$0xff] }
 0x1d7   : > { %v1448_v28 = vmul.f32 %v1416_v11, %v1384_v15  ;;  %v1388_v60 = vmax.f32 %v1356_v50, 0.0  ;;  %v1436_v62 = vld [vmem:[#allocation8 + $0xc8] sm:$0xff]  ;;  %v1355_v0 = vadd.f32 %v2839_v20, %v1311_v46  ;;  %v1404_v2 = vmax.f32 %v1372_v55, 0.0  ;;  %v1318_v11 = vld [vmem:[#allocation2 + $0x78] sm:$0xff]  ;;  %v1315_v26 = vld [vmem:[#allocation2 + $0x60] sm:$0xff] }
 0x1d8   : > { %2009 = vmatpush3.bf16.msra.mxu0 %v2331_v19  ;;  %2075 = vmatpush3.bf16.msra.mxu1 %v2331_v19  ;;  %v1351_v19 = vadd.f32 %v2839_v20, %v1307_v1  ;;  %v1390_v1 = vmax.f32 %v1358_v53, 0.0  ;;  %v1357_v4 = vadd.f32 %v2839_v20, %v1313_v51  ;;  %v1332_v17 = vld [vmem:[#allocation2 + $0xf8] sm:$0xff]  ;;  %v1373_v22 = vadd.f32 %v2839_v20, %v1329_v5  ;;  %v1437_v30 = vld [vmem:[#allocation8 + $0xd0] sm:$0xff]  ;;  %v1424_v36 = vld [vmem:[#allocation8 + $0x68] sm:$0xff] }
 0x1d9   : > { %2010 = vmatprep.subr.bf16.mxu0 %v2332_v23  ;;  %2068 = vmatprep.subr.bf16.mxu1 %v2332_v23  ;;  %v1483_v23 = vpack.c.bf16 %v1461_v10, %v1459_v3  ;;  %v1478_v42 = vpack.c.bf16 %v1450_v29, %v1448_v28  ;;  %v1406_v3 = vmax.f32 %v1374_v56, 0.0  ;;  %v1452_v8 = vmul.f32 %v1420_v54, %v1388_v60  ;;  %v1334_v25 = vld [vmem:[#allocation2 + $0x98] sm:$0xff]  ;;  %v1435_v29 = vld [vmem:[#allocation8 + $0xc0] sm:$0xff] }
 0x1da   : > { %v1383_v31 = vmax.f32 %v1351_v19, 0.0  ;;  %v1371_v10 = vadd.f32 %v2839_v20, %v1327_v57  ;;  %v1454_v12 = vmul.f32 %v1422_v61, %v1390_v1  ;;  %v1468_v13 = vmul.f32 %v1436_v62, %v1404_v2  ;;  %v1421_v19 = vld [vmem:[#allocation8 + $0x50] sm:$0xff]  ;;  %v1426_v37 = vld [vmem:[#allocation8 + $0x78] sm:$0xff]  ;;  %v1331_v39 = vld [vmem:[#allocation2 + $0xa0] sm:$0xff] }
 0x1db   : > { %v1389_v15 = vmax.f32 %v1357_v4, 0.0  ;;  %v1360_v24 = vadd.f32 %v2841_v21, %v1316_v6  ;;  %v1405_v34 = vmax.f32 %v1373_v22, 0.0  ;;  %v1376_v38 = vadd.f32 %v2841_v21, %v1332_v17  ;;  %v1423_v61 = vld [vmem:[#allocation8 + $0x60] sm:$0xff]  ;;  %v1425_v2 = vld [vmem:[#allocation8 + $0x70] sm:$0xff] }
 0x1dc   : > { %2011 = vmatpush3.bf16.msra.mxu0 %v2333_v52  ;;  %2076 = vmatpush3.bf16.msra.mxu1 %v2333_v52  ;;  %v2865_v47 = vmul.f32 %v1415_v32, %v1383_v31  ;;  %v1486_v52 = vpack.c.bf16 %v1466_v43, %v1464_v35  ;;  %v1480_v27 = vpack.c.bf16 %v1454_v12, %v1452_v8  ;;  %v1317_v32 = vld [vmem:[#allocation2 + $0x8] sm:$0xff]  ;;  %v1441_v4 = vld [vmem:[#allocation8 + $0xf0] sm:$0xff]  ;;  %v2890_v12 = vld [vmem:[%s2968_s16] ss:$0 sm:$0xff] }
 0x1dd   : > { %2012 = vmatprep.subr.bf16.mxu0 %v2334_v59  ;;  %2069 = vmatprep.subr.bf16.mxu1 %v2334_v59  ;;  %v1465_v59 = vmul.f32 %v1433_v45, %v1401_v49  ;;  %v1362_v31 = vadd.f32 %v2841_v21, %v1318_v11  ;;  %v1392_v35 = vmax.f32 %v1360_v24, 0.0  ;;  %v1453_v40 = vmul.f32 %v1421_v19, %v1389_v15  ;;  %v1440_v43 = vld [vmem:[#allocation8 + $0xe8] sm:$0xff]  ;;  %v1333_v45 = vld [vmem:[#allocation2 + $0x20] sm:$0xff]  ;;  %v1442_v49 = vld [vmem:[#allocation8 + $0xf8] sm:$0xff] }
 0x1de   : > { %v1477_v7 = vpack.c.bf16 %v2867_v48, %v2865_v47  ;;  %v1359_v44 = vadd.f32 %v2839_v20, %v1315_v26  ;;  %v1469_v47 = vmul.f32 %v1437_v30, %v1405_v34  ;;  %v1408_v48 = vmax.f32 %v1376_v38, 0.0 }
 0x1df   : > { %v1485_v18 = vpack.c.bf16 %v1465_v59, %v1463_v58  ;;  %v1394_v41 = vmax.f32 %v1362_v31, 0.0  ;;  %v1361_v50 = vadd.f32 %v2839_v20, %v1317_v32  ;;  %v1456_v51 = vmul.f32 %v1424_v36, %v1392_v35 }
 0x1e0   : > { %2013 = vmatpush3.bf16.msra.mxu0 %v2335_v14  ;;  %2077 = vmatpush3.bf16.msra.mxu1 %v2335_v14  ;;  %v1470_v14 = vmul.f32 %v1438_v63, %v1406_v3  ;;  %v1375_v54 = vadd.f32 %v2839_v20, %v1331_v39  ;;  %v1377_v55 = vadd.f32 %v2839_v20, %v1333_v45  ;;  %v1391_v58 = vmax.f32 %v1359_v44, 0.0  ;;  %v1439_v3 = vld [vmem:[#allocation8 + $0xe0] sm:$0xff] }
 0x1e1   : > { %v1393_v60 = vmax.f32 %v1361_v50, 0.0 }
 0x1e2   : > { %v1488_v28 = vpack.c.bf16 %v1470_v14, %v1468_v13  ;;  %v1407_v62 = vmax.f32 %v1375_v54, 0.0  ;;  %v1409_v63 = vmax.f32 %v1377_v55, 0.0  ;;  %v1455_v5 = vmul.f32 %v1423_v61, %v1391_v58 }
 0x1e3   : > { %1659 = vmatmul.mubr.bf16.vlgmr.msra.gmra.mxu0 %v1475_v9  ;;  %1691 = vmatmul.mubr.bf16.vlgmr.msra.gmra.mxu1 %v1483_v23  ;;  %v1387_v9 = vmax.f32 %v1355_v0, 0.0  ;;  %v1403_v23 = vmax.f32 %v1371_v10, 0.0  ;;  %v1457_v6 = vmul.f32 %v1425_v2, %v1393_v60 }
 0x1e4   : > { %1666 = vmatprep.mubr.bf16.mxu0 %v1478_v42  ;;  %1698 = vmatprep.mubr.bf16.mxu1 %v1486_v52  ;;  %v1378_v42 = vadd.f32 %v2841_v21, %v1334_v25  ;;  %v1458_v52 = vmul.f32 %v1426_v37, %v1394_v41  ;;  %v1472_v21 = vmul.f32 %v1440_v43, %v1408_v48 }
 0x1e5   : > { %v1451_v33 = vmul.f32 %v1419_v16, %v1387_v9  ;;  %v1467_v46 = vmul.f32 %v1435_v29, %v1403_v23  ;;  %v1473_v8 = vmul.f32 %v1441_v4, %v1409_v63  ;;  %v1481_v20 = vpack.c.bf16 %v1457_v6, %v1455_v5 }
 0x1e6   : > { %v1410_v53 = vmax.f32 %v1378_v42, 0.0  ;;  %v1482_v0 = vpack.c.bf16 %v1458_v52, %v1456_v51 }
 0x1e7   : > { %v1479_v56 = vpack.c.bf16 %v1453_v40, %v1451_v33  ;;  %v1487_v59 = vpack.c.bf16 %v1469_v47, %v1467_v46 }
 0x1e8   : > { %v1474_v57 = vmul.f32 %v1442_v49, %v1410_v53 }
 0x1ea   : > { %v1490_v1 = vpack.c.bf16 %v1474_v57, %v1472_v21 }
 0x1eb   : > { %1667 = vmatmul.mubr.bf16.gmra.mxu0 %v1477_v7  ;;  %1699 = vmatmul.mubr.bf16.gmra.mxu1 %v1485_v18  ;;  %v1471_v7 = vmul.f32 %v1439_v3, %v1407_v62 }
 0x1ec   : > { %1674 = vmatprep.mubr.bf16.mxu0 %v1480_v27  ;;  %1706 = vmatprep.mubr.bf16.mxu1 %v1488_v28 }
 0x1ed   : > { %v1489_v9 = vpack.c.bf16 %v1473_v8, %v1471_v7 }
 0x1f3   : > { %1675 = vmatmul.mubr.bf16.gmra.mxu0 %v1479_v56  ;;  %1707 = vmatmul.mubr.bf16.gmra.mxu1 %v1487_v59 }
 0x1f4   : > { %1682 = vmatprep.mubr.bf16.mxu0 %v1482_v0  ;;  %1714 = vmatprep.mubr.bf16.mxu1 %v1490_v1 }
 0x1fb   : > { %1683 = vmatmul.mubr.bf16.gmra.mxu0 %v1481_v20  ;;  %1715 = vmatmul.mubr.bf16.gmra.mxu1 %v1489_v9 }
 0x2a3   : > { %v2014_v10 = vpop.f32.mrf.mxu0  ;;  %v2038_v11 = vpop.f32.mrf.mxu1 }
 0x2a5   : > { %v2015_v13 = vpop.f32.mrf.mxu0  ;;  %v2039_v14 = vpop.f32.mrf.mxu1 }
 0x2a6   : > { %v2016_v15 = vadd.f32 %v2015_v13, %v2014_v10  ;;  %v2040_v16 = vadd.f32 %v2039_v14, %v2038_v11 }
 0x2a7   : > { %v2017_v17 = vpop.f32.mrf.mxu0  ;;  %v2041_v18 = vpop.f32.mrf.mxu1 }
 0x2a8   : > { %v1661_v19 = vadd.f32 %v2016_v15, %v2890_v12  ;;  %v1693_v22 = vadd.f32 %v2040_v16, %v2890_v12 }
 0x2a9   : > { %v2018_v23 = vpop.f32.mrf.mxu0  ;;  %v2042_v24 = vpop.f32.mrf.mxu1 }
 0x2aa   : > { %1723 = vst [vmem:[#allocation11] sm:$0xff] %v1661_v19  ;;  %1731 = vst [vmem:[#allocation11 + $0x40] sm:$0xff] %v1693_v22  ;;  %v2019_v25 = vadd.f32 %v2018_v23, %v2017_v17  ;;  %v2043_v26 = vadd.f32 %v2042_v24, %v2041_v18 }
 0x2ab   : > { %v2020_v27 = vpop.f32.mrf.mxu0  ;;  %v2044_v28 = vpop.f32.mrf.mxu1 }
 0x2ac   : > { %v1664_v29 = vadd.f32 %v2019_v25, %v2890_v12  ;;  %v1696_v30 = vadd.f32 %v2043_v26, %v2890_v12 }
 0x2ad   : > { %v2021_v31 = vpop.f32.mrf.mxu0  ;;  %v2045_v32 = vpop.f32.mrf.mxu1 }
 0x2ae   : > { %1724 = vst [vmem:[#allocation11 + $0x8] sm:$0xff] %v1664_v29  ;;  %1732 = vst [vmem:[#allocation11 + $0x48] sm:$0xff] %v1696_v30  ;;  %v2022_v33 = vadd.f32 %v2021_v31, %v2020_v27  ;;  %v2046_v34 = vadd.f32 %v2045_v32, %v2044_v28 }
 0x2af   : > { %v2023_v35 = vpop.f32.mrf.mxu0  ;;  %v2047_v36 = vpop.f32.mrf.mxu1 }
 0x2b0   : > { %v1669_v37 = vadd.f32 %v2022_v33, %v2890_v12  ;;  %v1701_v38 = vadd.f32 %v2046_v34, %v2890_v12 }
 0x2b1   : > { %v2024_v39 = vpop.f32.mrf.mxu0  ;;  %v2048_v40 = vpop.f32.mrf.mxu1 }
 0x2b2   : > { %1725 = vst [vmem:[#allocation11 + $0x10] sm:$0xff] %v1669_v37  ;;  %1733 = vst [vmem:[#allocation11 + $0x50] sm:$0xff] %v1701_v38  ;;  %v2025_v41 = vadd.f32 %v2024_v39, %v2023_v35  ;;  %v2049_v42 = vadd.f32 %v2048_v40, %v2047_v36 }
 0x2b3   : > { %v2026_v43 = vpop.f32.mrf.mxu0  ;;  %v2050_v44 = vpop.f32.mrf.mxu1 }
 0x2b4   : > { %v1672_v45 = vadd.f32 %v2025_v41, %v2890_v12  ;;  %v1704_v46 = vadd.f32 %v2049_v42, %v2890_v12 }
 0x2b5   : > { %v2027_v47 = vpop.f32.mrf.mxu0  ;;  %v2051_v48 = vpop.f32.mrf.mxu1 }
 0x2b6   : > { %1726 = vst [vmem:[#allocation11 + $0x18] sm:$0xff] %v1672_v45  ;;  %1734 = vst [vmem:[#allocation11 + $0x58] sm:$0xff] %v1704_v46  ;;  %v2028_v49 = vadd.f32 %v2027_v47, %v2026_v43  ;;  %v2052_v50 = vadd.f32 %v2051_v48, %v2050_v44 }
 0x2b7   : > { %v2029_v51 = vpop.f32.mrf.mxu0  ;;  %v2053_v52 = vpop.f32.mrf.mxu1 }
 0x2b8   : > { %v1677_v53 = vadd.f32 %v2028_v49, %v2890_v12  ;;  %v1709_v54 = vadd.f32 %v2052_v50, %v2890_v12 }
 0x2b9   : > { %v2030_v21 = vpop.f32.mrf.mxu0  ;;  %v2054_v55 = vpop.f32.mrf.mxu1 }
 0x2ba   : > { %1727 = vst [vmem:[#allocation11 + $0x20] sm:$0xff] %v1677_v53  ;;  %1735 = vst [vmem:[#allocation11 + $0x60] sm:$0xff] %v1709_v54  ;;  %v2031_v56 = vadd.f32 %v2030_v21, %v2029_v51  ;;  %v2055_v57 = vadd.f32 %v2054_v55, %v2053_v52 }
 0x2bb   : > { %v2032_v58 = vpop.f32.mrf.mxu0  ;;  %v2056_v59 = vpop.f32.mrf.mxu1 }
 0x2bc   : > { %v1680_v60 = vadd.f32 %v2031_v56, %v2890_v12  ;;  %v1712_v61 = vadd.f32 %v2055_v57, %v2890_v12 }
 0x2bd   : > { %v2033_v62 = vpop.f32.mrf.mxu0  ;;  %v2057_v63 = vpop.f32.mrf.mxu1 }
 0x2be   : > { %1728 = vst [vmem:[#allocation11 + $0x28] sm:$0xff] %v1680_v60  ;;  %1736 = vst [vmem:[#allocation11 + $0x68] sm:$0xff] %v1712_v61  ;;  %v2034_v0 = vadd.f32 %v2033_v62, %v2032_v58  ;;  %v2058_v1 = vadd.f32 %v2057_v63, %v2056_v59 }
 0x2bf   : > { %v2035_v2 = vpop.f32.mrf.mxu0  ;;  %v2059_v3 = vpop.f32.mrf.mxu1 }
 0x2c0   : > { %v1685_v4 = vadd.f32 %v2034_v0, %v2890_v12  ;;  %v1717_v5 = vadd.f32 %v2058_v1, %v2890_v12 }
 0x2c1   : > { %v2036_v6 = vpop.f32.mrf.mxu0  ;;  %v2060_v7 = vpop.f32.mrf.mxu1 }
 0x2c2   : > { %1729 = vst [vmem:[#allocation11 + $0x30] sm:$0xff] %v1685_v4  ;;  %1737 = vst [vmem:[#allocation11 + $0x70] sm:$0xff] %v1717_v5  ;;  %v2037_v8 = vadd.f32 %v2036_v6, %v2035_v2  ;;  %v2061_v20 = vadd.f32 %v2060_v7, %v2059_v3 }
 0x2c4   : > { %v1688_v9 = vadd.f32 %v2037_v8, %v2890_v12  ;;  %v1720_v10 = vadd.f32 %v2061_v20, %v2890_v12 }
 0x2c6   : > { %1730 = vst [vmem:[#allocation11 + $0x38] sm:$0xff] %v1688_v9  ;;  %1738 = vst [vmem:[#allocation11 + $0x78] sm:$0xff] %v1720_v10 }
 0x2c7 PF: > { %p2113_p2 = scmp.eq.s32.totalorder %s2615_s27, 1  ;;  %s2548_s18 = smov [#allocation11]  }
 0x2c8   : > { %s1748_s20 = sshll.u32 %s2548_s18, 4  ;;  %s1749_s20 = int_to_ptr.vmem [resolvable:$true] %s1748_s20 }
 0x2c9   : > { %s2444_s7 = scalar_lea.vmem %s1749_s20, 2048  ;;  %p2451_p11 = scmp.lt.s32.totalorder %s1749_s20, %s1749_s20 }
 0x2ca   : > { %p2445_p5 = scmp.ne.s32.totalorder %s1749_s20, %s2444_s7  ;;  %p2452_p4 = scmp.lt.s32.totalorder %s2444_s7, %s2444_s7 }
 0x2cc   : > { %p2446_p13 = pnand %p2445_p5, %p2113_p2  ;;  %p2453_p10 = por %p2452_p4, %p2451_p11 }
 0x2ce   : > { %p2447_p9 = pneg %p2446_p13 }
 0x2d0   : > { %p2454_p0 = pnand %p2453_p10, %p2447_p9 }
 0x2d2   : > { %2457 = shalt.err (!%p2454_p0)
}
 0x2d3   : > { %s2549_s17 = smov 128   ;;  %s2550_s13 = smov 8  }
 0x2d4   : > { %s2969_s9 = sld [smem:[#allocation22_spill]] }
 0x2da   : > { %2091 = dma.vmem_to_hbm [thread:$0]  (%p2113_p2), %s1749_s20, 2048, %s2969_s9, [#allocation5], %s2549_s17, %s2549_s17, %s2550_s13  }
 0x2db   : > { %2509 = dma.done.wait (%p2113_p2), [#allocation5], 2048  }
 0x2dc   : > { %2511 = vsyncadd (%p2113_p2), [#allocation5], 4294965248 }
 0x2dd PF: > { %s24_s26 = sadd.s32 1, %s2534_s26   ;;  %s2970_s8 = smov %s2701_s21 }
 0x2de   : > { %p21_p8 = scmp.ge.s32.totalorder %s24_s26, 4   ;;  %s2971_s3 = sld [smem:[#allocation17_spill]] }
 0x2df   : > { %s2972_s21 = smov %s2518_s22  ;;  %s2973_s22 = smov %s2522_s23 }
 0x2e0   : > { %s2974_s23 = smov %s2970_s8  ;;  %s2975_s24 = smov %s2530_s25 }
 0x2e1   :  { %23 = sbr.rel (!%p21_p8) target bundleno = 14 (0xe), region = 112 }
 0x2e4   : > { %s2976_s25 = smov %s2971_s3 }
 0x2e6   :  { %1764 = vsyncpa [#allocation4], 1 }
 0x2e7   :  { %1766 = vsyncpa [#allocation4 + $0x1], 1 }
 0x2e8   :  { %1767 = vsyncpa [#allocation7], 1 }
 0x2e9   :  { %1769 = vsyncpa [#allocation7 + $0x1], 1 }
 0x2ea   :  { %1770 = vsyncpa [#allocation10], 1 }
 0x2eb   :  { %1771 = vsyncpa [#allocation5], 1 }
 0x2ec   :  { %1773 = vsyncpa [#allocation5 + $0x1], 1 }

</bundles_post_ra>
